<compile_context>
chip_gen: v7x
topology: tpu7x:2x2x1
jax: 0.10.0
libtpu: 0.0.40
codegen_flags: <defaults>
</compile_context>

<pallas_src>
import jax
import jax.numpy as jnp
from jax.experimental import pallas as pl
from jax.experimental.pallas import tpu as pltpu


_NEG = -1e30   # "safe -inf": avoids inf-inf NaNs in the running-max update.
_SUB = 16      # bf16 sublane granularity for the node (second-minor) dim.
_LANE = 128


def _round_up(v, m):
    return (v + m - 1) // m * m


def _set2set_kernel(x_ref, batch_ref, wq_ref, wr_ref, bias_ref,
                    q_out_ref, r_out_ref,
                    h_ref, c_ref, qbf_ref, r_ref, m_ref, l_ref, racc_ref):
    t = pl.program_id(0)            # processing step
    n = pl.program_id(1)            # node tile
    num_steps = pl.num_programs(0)
    num_tiles = pl.num_programs(1)
    B, Cp = h_ref.shape             # graphs, (padded) channels

    # ---- per-step prologue: LSTM cell once per step, reset softmax state ----
    @pl.when(n == 0)
    def _step_start():
        @pl.when(t == 0)
        def _init_state():
            h_ref[...] = jnp.zeros_like(h_ref)
            c_ref[...] = jnp.zeros_like(c_ref)
            r_ref[...] = jnp.zeros_like(r_ref)

        # LSTM cell on q_star = [q, r].  Since q_{t-1} == h_{t-1}, W_hh has been
        # folded into the q-rows of W_ih on the host (wq_ref), so only two gate
        # matmuls remain.  r is stored transposed [Cp, B]; its first dim is
        # contracted directly (no in-kernel transpose / concat).
        gates = (
            jnp.dot(h_ref[...], wq_ref[...], preferred_element_type=jnp.float32)
            + jnp.einsum('cb,cf->bf', r_ref[...], wr_ref[...],
                         preferred_element_type=jnp.float32)
            + bias_ref[...])                                    # [B, 4*Cp]
        # PyTorch gate order: i, f, g, o (slices are lane-aligned: Cp % 128 == 0).
        i_g = jax.nn.sigmoid(gates[:, 0 * Cp:1 * Cp])
        f_g = jax.nn.sigmoid(gates[:, 1 * Cp:2 * Cp])
        g_g = jnp.tanh(gates[:, 2 * Cp:3 * Cp])
        o_g = jax.nn.sigmoid(gates[:, 3 * Cp:4 * Cp])
        c_new = f_g * c_ref[...] + i_g * g_g
        h_new = o_g * jnp.tanh(c_new)
        c_ref[...] = c_new
        h_ref[...] = h_new                                      # q_t == h_t
        qbf_ref[...] = h_new.astype(jnp.bfloat16)               # hoisted cast

        # reset online-softmax state for this step
        m_ref[...] = jnp.full_like(m_ref, _NEG)
        l_ref[...] = jnp.zeros_like(l_ref)
        racc_ref[...] = jnp.zeros_like(racc_ref)

    # ---- online segment softmax + weighted sum over this node tile ---------
    x_tile = x_ref[...]                                         # [TN, Cp] bf16
    tn = x_tile.shape[0]
    col = jax.lax.broadcasted_iota(jnp.int32, (tn, B), 1)
    mask = batch_ref[...] == col                                # [TN, B] bool
    # Padded rows carry an out-of-range graph id -> all-False mask row, and the
    # wrapper zero-pads x, so they contribute nothing to max / denom / r.
    # (Their ex == exp(0) == 1 is harmless ONLY because padded x rows are 0.)
    maskb = mask.astype(jnp.bfloat16)       # single numeric mask (exact 0/1)

    # Scores via MXU with K = Cp (a proper MXU shape).  q is bf16 here — a
    # deliberate perf choice (the reference keeps q f32); covered by tolerance.
    s = jnp.einsum('nc,bc->nb', x_tile, qbf_ref[...],
                   preferred_element_type=jnp.float32)          # [TN, B]

    tile_max = jnp.max(jnp.where(mask, s, _NEG), axis=0, keepdims=True)  # [1,B]
    m_old = m_ref[...]
    m_new = jnp.maximum(m_old, tile_max)
    corr = jnp.exp(m_old - m_new)                                        # [1,B]
    # Fused shifted-score reduce: e_i - m_new[batch_i] in one masked lane sum.
    e_shift = jnp.sum(jnp.where(mask, s - m_new, 0.0),
                      axis=-1, keepdims=True)                            # [TN,1]
    ex = jnp.exp(e_shift)                                                # [TN,1]
    tile_sum = jnp.sum(jnp.where(mask, ex, 0.0), axis=0, keepdims=True)  # [1,B]

    m_ref[...] = m_new
    l_ref[...] = l_ref[...] * corr + tile_sum

    # Unnormalized numerator, kept transposed [Cp, B] so `corr` broadcasts over
    # lanes; the per-node attention vector `a` is never materialized.
    p_bf = ex.astype(jnp.bfloat16) * x_tile                     # [TN, Cp] bf16
    contrib = jnp.einsum('nc,nb->cb', p_bf, maskb,
                         preferred_element_type=jnp.float32)    # [Cp, B]  K=TN
    racc_ref[...] = racc_ref[...] * corr + contrib

    # ---- per-step epilogue: normalize r; emit q_T / r_T at the very end ----
    @pl.when(n == num_tiles - 1)
    def _step_end():
        inv_l = 1.0 / (l_ref[...] + 1e-16)     # exact divide, once per step
        r_ref[...] = racc_ref[...] * inv_l     # [Cp, B]

        @pl.when(t == num_steps - 1)
        def _write_out():
            q_out_ref[...] = h_ref[...]
            r_out_ref[...] = r_ref[...]


def set2set_pallas(x, batch, wih, whh, b_ih, b_hh, batch_size, processing_steps,
                   *, block_n=1024, allow_resident=True, vmem_budget_bytes=None):
    """Set2Set forward.  x:[N,C] f32, batch:[N] int graph ids in [0,B).

    wih:[4C,2C], whh:[4C,C], b_ih/b_hh:[4C] are the single-layer PyTorch LSTM
    parameters.  Returns q_star:[B, 2C] f32.
    """
    # TODO(synk): num_layers > 1 (stacked LSTM) not implemented (default is 1).
    N, C = x.shape
    B = int(batch_size)
    T = int(processing_steps)
    assert T >= 1
    assert wih.shape == (4 * C, 2 * C) and whh.shape == (4 * C, C)

    Cp = _round_up(C, _LANE)     # lane-dense / MXU-K-aligned channel dim

    # ---- host-side weight plumbing ----------------------------------------
    # W_hh is folded into the q-rows of W_ih (q_t == h_t), and each gate block
    # is zero-padded from C to Cp columns so gate slices stay lane-aligned and
    # padded channels stay exactly zero through the whole recurrence.
    wih_t = jnp.asarray(wih, jnp.float32).T              # [2C, 4C]
    whh_t = jnp.asarray(whh, jnp.float32).T              # [C, 4C]
    wq = wih_t[:C, :] + whh_t                            # acts on q (== h)
    wr = wih_t[C:, :]                                    # acts on r
    bias = jnp.asarray(b_ih, jnp.float32) + jnp.asarray(b_hh, jnp.float32)

    wq_p = jnp.zeros((Cp, 4 * Cp), jnp.float32)
    wr_p = jnp.zeros((Cp, 4 * Cp), jnp.float32)
    bias_p = jnp.zeros((1, 4 * Cp), jnp.float32)
    for g in range(4):
        wq_p = wq_p.at[:C, g * Cp:g * Cp + C].set(wq[:, g * C:(g + 1) * C])
        wr_p = wr_p.at[:C, g * Cp:g * Cp + C].set(wr[:, g * C:(g + 1) * C])
        bias_p = bias_p.at[0, g * Cp:g * Cp + C].set(bias[g * C:(g + 1) * C])

    # ---- per-generation VMEM budget & node tiling --------------------------
    if vmem_budget_bytes is None:
        try:
            cap = int(pltpu.get_tpu_info().vmem_capacity_bytes)
        except Exception:
            cap = 64 * 1024 * 1024
        # ~96 MiB on v5e/v6e (128 MiB physical), ~48 MiB on v7x (64 MiB).
        vmem_budget_bytes = max(32 * 1024 * 1024, cap * 3 // 4)

    Bl = _round_up(B, _LANE)     # lane padding when B is the minor dim
    Bs = _round_up(B, 8)         # sublane padding when B is the major dim
    fixed_bytes = (
        2 * (2 * Cp * 4 * Cp + 4 * Cp) * 4                 # dbl-buffered f32 weights+bias
        + (2 * Bs * Cp + 2 * 8 * Bl + 2 * Cp * Bl) * 4     # h, c, m, l, r, racc
        + Bs * Cp * 2                                      # bf16 q scratch
        + 2 * (Bs * Cp + Cp * Bl) * 4                      # dbl-buffered outputs
        + (2 << 20))                                       # mosaic internal slack
    per_row_bytes = 2 * (Cp * 2 + _LANE * 4)               # x row + id row, x2 buffers
    x_budget = vmem_budget_bytes - fixed_bytes

    n_unit = _round_up(max(N, 1), _SUB)
    if allow_resident and n_unit * per_row_bytes <= x_budget:
        tn = n_unit        # resident-x: single node tile, x DMA'd once for all T steps
    else:
        tn = min(_round_up(block_n, _SUB), n_unit)
        if x_budget > 0:
            cap_rows = (x_budget // per_row_bytes) // _SUB * _SUB
            if cap_rows >= _SUB:
                tn = min(tn, int(cap_rows))
        tn = max(_SUB, tn)
    n_pad = _round_up(N, tn)
    num_tiles = n_pad // tn

    # ---- host-side input padding -------------------------------------------
    # Padded rows MUST be zero in x and carry an out-of-range graph id (== B):
    # the kernel relies on this so they contribute nothing to max / denom / r.
    x_bf = jnp.zeros((n_pad, Cp), jnp.bfloat16).at[:N, :C].set(x.astype(jnp.bfloat16))
    batch_p = jnp.full((n_pad, 1), B, jnp.int32)
    batch_p = batch_p.at[:N, 0].set(jnp.asarray(batch, jnp.int32))

    x_reads = 1 if num_tiles == 1 else T
    cost = pl.CostEstimate(
        flops=int(T * (4 * n_pad * Cp * B + 4 * B * Cp * 4 * Cp + 12 * n_pad * B)),
        transcendentals=int(T * (n_pad + 2 * Bl + 4 * B * Cp)),
        bytes_accessed=int(x_reads * n_pad * Cp * 2 + 2 * Cp * 4 * Cp * 4
                           + n_pad * 4 + 2 * B * Cp * 4),
    )

    q_out, r_out_cb = pl.pallas_call(
        _set2set_kernel,
        out_shape=(jax.ShapeDtypeStruct((B, Cp), jnp.float32),   # q_T
                   jax.ShapeDtypeStruct((Cp, B), jnp.float32)),  # r_T (transposed)
        grid_spec=pltpu.PrefetchScalarGridSpec(
            num_scalar_prefetch=0,
            grid=(T, num_tiles),                      # steps outer, node tiles inner
            in_specs=[
                pl.BlockSpec((tn, Cp), lambda t, n: (n, 0)),      # x (resident if 1 tile)
                pl.BlockSpec((tn, 1), lambda t, n: (n, 0)),       # graph ids
                pl.BlockSpec((Cp, 4 * Cp), lambda t, n: (0, 0)),  # W_q (W_ih q-rows + W_hh)
                pl.BlockSpec((Cp, 4 * Cp), lambda t, n: (0, 0)),  # W_r (W_ih r-rows)
                pl.BlockSpec((1, 4 * Cp), lambda t, n: (0, 0)),   # b_ih + b_hh
            ],
            out_specs=(pl.BlockSpec((B, Cp), lambda t, n: (0, 0)),
                       pl.BlockSpec((Cp, B), lambda t, n: (0, 0))),
            scratch_shapes=[
                pltpu.VMEM((B, Cp), jnp.float32),    # h (== q)
                pltpu.VMEM((B, Cp), jnp.float32),    # c
                pltpu.VMEM((B, Cp), jnp.bfloat16),   # q in bf16 (hoisted cast)
                pltpu.VMEM((Cp, B), jnp.float32),    # r_t (kept transposed)
                pltpu.VMEM((1, B), jnp.float32),     # running per-graph max
                pltpu.VMEM((1, B), jnp.float32),     # running per-graph denom
                pltpu.VMEM((Cp, B), jnp.float32),    # running r numerator
            ],
        ),
        compiler_params=pltpu.CompilerParams(
            # TODO(synk): a leading "parallel" graph axis (sorted batch +
            # scalar-prefetch offsets) would let v7x's second TensorCore work.
            dimension_semantics=("arbitrary", "arbitrary"),
            vmem_limit_bytes=int(vmem_budget_bytes),
        ),
        cost_estimate=cost,
    )(x_bf, batch_p, wq_p, wr_p, bias_p)

    # q_star = [q_T || r_T]; un-pad / transpose / concat once, outside the kernel.
    return jnp.concatenate([q_out[:, :C], r_out_cb[:C, :].T], axis=-1)


def set2set_reference(x, batch, wih, whh, b_ih, b_hh, batch_size, processing_steps):
    """Pure-JAX reference mirroring the PyTorch module (num_layers=1)."""
    N, C = x.shape
    h = jnp.zeros((batch_size, C), jnp.float32)
    c = jnp.zeros((batch_size, C), jnp.float32)
    q_star = jnp.zeros((batch_size, 2 * C), jnp.float32)
    for _ in range(processing_steps):
        gates = q_star @ wih.T + b_ih + h @ whh.T + b_hh
        i_g = jax.nn.sigmoid(gates[:, 0 * C:1 * C])
        f_g = jax.nn.sigmoid(gates[:, 1 * C:2 * C])
        g_g = jnp.tanh(gates[:, 2 * C:3 * C])
        o_g = jax.nn.sigmoid(gates[:, 3 * C:4 * C])
        c = f_g * c + i_g * g_g
        h = o_g * jnp.tanh(c)
        q = h
        e = jnp.sum(x * q[batch], axis=-1, keepdims=True)
        gmax = jax.ops.segment_max(e, batch, num_segments=batch_size)
        out = jnp.exp(e - gmax[batch])
        denom = jax.ops.segment_sum(out, batch, num_segments=batch_size)
        a = out / (denom[batch] + 1e-16)
        r = jax.ops.segment_sum(a * x, batch, num_segments=batch_size)
        q_star = jnp.concatenate([q, r], axis=-1)
    return q_star


if __name__ == "__main__":
    # Small deterministic problem: 48 nodes, 8 features, 4 graphs, 3 steps.
    N, C, B, T = 48, 8, 4, 3
    key = jax.random.PRNGKey(0)
    kx, k1, k2, k3, k4, kp = jax.random.split(key, 6)

    x = jax.random.normal(kx, (N, C), jnp.float32)
    batch = jnp.repeat(jnp.arange(B, dtype=jnp.int32), N // B)
    # Shuffle nodes so graph membership is interleaved across tiles.
    perm = jax.random.permutation(kp, N)
    x, batch = x[perm], batch[perm]

    # LSTM parameters (PyTorch shapes), deterministic uniform(-1/sqrt(C), 1/sqrt(C)).
    bound = 1.0 / (C ** 0.5)
    wih = jax.random.uniform(k1, (4 * C, 2 * C), jnp.float32, -bound, bound)
    whh = jax.random.uniform(k2, (4 * C, C), jnp.float32, -bound, bound)
    b_ih = jax.random.uniform(k3, (4 * C,), jnp.float32, -bound, bound)
    b_hh = jax.random.uniform(k4, (4 * C,), jnp.float32, -bound, bound)

    # Reference sees the same bf16-quantized x the kernel streams from HBM
    # (the bf16 MXU inputs are a deliberate perf choice; stats stay f32).
    x_q = x.astype(jnp.bfloat16).astype(jnp.float32)
    ref = set2set_reference(x_q, batch, wih, whh, b_ih, b_hh, B, T)

    # 1) resident-x fast path: a single node tile, x DMA'd once for all steps.
    out_resident = jax.block_until_ready(
        set2set_pallas(x, batch, wih, whh, b_ih, b_hh, B, T))
    # 2) streamed path with tiny tiles (3 node tiles) to exercise the online
    #    segment softmax across tile boundaries.
    out_streamed = jax.block_until_ready(
        set2set_pallas(x, batch, wih, whh, b_ih, b_hh, B, T,
                       block_n=16, allow_resident=False))

    for out in (out_resident, out_streamed):
        assert out.shape == (B, 2 * C)
        assert bool(jnp.all(jnp.isfinite(out)))
        max_err = float(jnp.max(jnp.abs(out - ref)))
        assert jnp.allclose(out, ref, atol=5e-2, rtol=5e-2), (
            f"mismatch vs reference, max abs err = {max_err}")
    print("KERNEL_OK")
</pallas_src>

<mosaic_0001>
module attributes {stable_mosaic.version = 11 : i64} {
  func.func @_set2set_kernel(%arg0: i32, %arg1: i32, %arg2: memref<48x128xbf16, #tpu.memory_space<vmem>>, %arg3: memref<48x1xi32, #tpu.memory_space<vmem>>, %arg4: memref<128x512xf32, #tpu.memory_space<vmem>>, %arg5: memref<128x512xf32, #tpu.memory_space<vmem>>, %arg6: memref<1x512xf32, #tpu.memory_space<vmem>>, %arg7: memref<4x128xf32, #tpu.memory_space<vmem>>, %arg8: memref<128x4xf32, #tpu.memory_space<vmem>>, %arg9: memref<4x128xf32, #tpu.memory_space<vmem>>, %arg10: memref<4x128xf32, #tpu.memory_space<vmem>>, %arg11: memref<4x128xbf16, #tpu.memory_space<vmem>>, %arg12: memref<128x4xf32, #tpu.memory_space<vmem>>, %arg13: memref<1x4xf32, #tpu.memory_space<vmem>>, %arg14: memref<1x4xf32, #tpu.memory_space<vmem>>, %arg15: memref<128x4xf32, #tpu.memory_space<vmem>>) attributes {dimension_semantics = [#tpu.dimension_semantics<arbitrary>, #tpu.dimension_semantics<arbitrary>], iteration_bounds = array<i64: 3, 1>, scalar_prefetch = 0 : i64, scratch_operands = 7 : i64, tpu.core_type = #tpu.core_type<tc>, window_params = [{transform_indices = @transform_0, window_bounds = array<i64: 48, 128>}, {transform_indices = @transform_1, window_bounds = array<i64: 48, 1>}, {pipeline_mode = #tpu.pipeline_mode<synchronous>, transform_indices = @transform_2, window_bounds = array<i64: 128, 512>}, {pipeline_mode = #tpu.pipeline_mode<synchronous>, transform_indices = @transform_3, window_bounds = array<i64: 128, 512>}, {pipeline_mode = #tpu.pipeline_mode<synchronous>, transform_indices = @transform_4, window_bounds = array<i64: 1, 512>}, {pipeline_mode = #tpu.pipeline_mode<synchronous>, transform_indices = @transform_5, window_bounds = array<i64: 4, 128>}, {pipeline_mode = #tpu.pipeline_mode<synchronous>, transform_indices = @transform_6, window_bounds = array<i64: 128, 4>}]} {
    %c0_i32 = arith.constant 0 : i32
    %0 = arith.cmpi eq, %arg1, %c0_i32 : i32
    %1 = arith.extui %0 : i1 to i32
    %c0_i32_0 = arith.constant 0 : i32
    %2 = arith.cmpi ne, %1, %c0_i32_0 : i32
    scf.if %2 {
      %c0_i32_27 = arith.constant 0 : i32
      %51 = arith.cmpi eq, %arg0, %c0_i32_27 : i32
      %52 = arith.extui %51 : i1 to i32
      %c0_i32_28 = arith.constant 0 : i32
      %53 = arith.cmpi ne, %52, %c0_i32_28 : i32
      scf.if %53 {
        %cst_61 = arith.constant 0.000000e+00 : f32
        %100 = vector.broadcast %cst_61 : f32 to vector<4x128xf32>
        %c0_62 = arith.constant 0 : index
        %c0_63 = arith.constant 0 : index
        %101 = vector.load %arg9[%c0_62, %c0_63] : memref<4x128xf32, #tpu.memory_space<vmem>>, vector<4x128xf32>
        tpu.vector_store %arg9[%c0_62, %c0_63], %100 {strides = array<i32>} : memref<4x128xf32, #tpu.memory_space<vmem>>, vector<4x128xf32>,
        %cst_64 = arith.constant 0.000000e+00 : f32
        %102 = vector.broadcast %cst_64 : f32 to vector<4x128xf32>
        %c0_65 = arith.constant 0 : index
        %c0_66 = arith.constant 0 : index
        %103 = vector.load %arg10[%c0_65, %c0_66] : memref<4x128xf32, #tpu.memory_space<vmem>>, vector<4x128xf32>
        tpu.vector_store %arg10[%c0_65, %c0_66], %102 {strides = array<i32>} : memref<4x128xf32, #tpu.memory_space<vmem>>, vector<4x128xf32>,
        %cst_67 = arith.constant 0.000000e+00 : f32
        %104 = vector.broadcast %cst_67 : f32 to vector<128x4xf32>
        %c0_68 = arith.constant 0 : index
        %c0_69 = arith.constant 0 : index
        %105 = vector.load %arg12[%c0_68, %c0_69] : memref<128x4xf32, #tpu.memory_space<vmem>>, vector<128x4xf32>
        tpu.vector_store %arg12[%c0_68, %c0_69], %104 {strides = array<i32>} : memref<128x4xf32, #tpu.memory_space<vmem>>, vector<128x4xf32>,
      } else {
      }
      %c0_29 = arith.constant 0 : index
      %c0_30 = arith.constant 0 : index
      %54 = vector.load %arg9[%c0_29, %c0_30] : memref<4x128xf32, #tpu.memory_space<vmem>>, vector<4x128xf32>
      %c0_31 = arith.constant 0 : index
      %c0_32 = arith.constant 0 : index
      %55 = vector.load %arg4[%c0_31, %c0_32] : memref<128x512xf32, #tpu.memory_space<vmem>>, vector<128x512xf32>
      %cst_33 = arith.constant dense<0.000000e+00> : vector<4x512xf32>
      %56 = tpu.matmul %54, %55, %cst_33 {dimension_numbers = #tpu.dot_dimension_numbers<[1], [0], [0], [1], [0, 0, 1, 1], [], []>} : vector<4x128xf32>, vector<128x512xf32>, vector<4x512xf32> -> vector<4x512xf32>
      %c0_34 = arith.constant 0 : index
      %c0_35 = arith.constant 0 : index
      %57 = vector.load %arg12[%c0_34, %c0_35] : memref<128x4xf32, #tpu.memory_space<vmem>>, vector<128x4xf32>
      %c0_36 = arith.constant 0 : index
      %c0_37 = arith.constant 0 : index
      %58 = vector.load %arg5[%c0_36, %c0_37] : memref<128x512xf32, #tpu.memory_space<vmem>>, vector<128x512xf32>
      "tpu.trace_start"() <{level = 10 : i32, message = "cb,cf->bf"}> : () -> ()
      %cst_38 = arith.constant dense<0.000000e+00> : vector<4x512xf32>
      %59 = tpu.matmul %57, %58, %cst_38 {dimension_numbers = #tpu.dot_dimension_numbers<[0], [0], [1], [1], [0, 1, 1, 1], [], []>} : vector<128x4xf32>, vector<128x512xf32>, vector<4x512xf32> -> vector<4x512xf32>
      "tpu.trace_stop"() : () -> ()
      %60 = arith.addf %56, %59 : vector<4x512xf32>
      %c0_39 = arith.constant 0 : index
      %c0_40 = arith.constant 0 : index
      %61 = vector.load %arg6[%c0_39, %c0_40] : memref<1x512xf32, #tpu.memory_space<vmem>>, vector<1x512xf32>
      %62 = vector.broadcast %61 : vector<1x512xf32> to vector<4x512xf32>
      %63 = arith.addf %60, %62 : vector<4x512xf32>
      %64 = vector.extract_strided_slice %63 {offsets = [0, 0], sizes = [4, 128], strides = [1, 1]} : vector<4x512xf32> to vector<4x128xf32>
      %65 = arith.negf %64 : vector<4x128xf32>
      %66 = math.exp %65 : vector<4x128xf32>
      %cst_41 = arith.constant 1.000000e+00 : f32
      %67 = vector.broadcast %cst_41 : f32 to vector<4x128xf32>
      %68 = arith.addf %67, %66 : vector<4x128xf32>
      %69 = arith.divf %67, %68 : vector<4x128xf32>
      %70 = vector.extract_strided_slice %63 {offsets = [0, 128], sizes = [4, 128], strides = [1, 1]} : vector<4x512xf32> to vector<4x128xf32>
      %71 = arith.negf %70 : vector<4x128xf32>
      %72 = math.exp %71 : vector<4x128xf32>
      %cst_42 = arith.constant 1.000000e+00 : f32
      %73 = vector.broadcast %cst_42 : f32 to vector<4x128xf32>
      %74 = arith.addf %73, %72 : vector<4x128xf32>
      %75 = arith.divf %73, %74 : vector<4x128xf32>
      %76 = vector.extract_strided_slice %63 {offsets = [0, 256], sizes = [4, 128], strides = [1, 1]} : vector<4x512xf32> to vector<4x128xf32>
      %77 = math.tanh %76 : vector<4x128xf32>
      %78 = vector.extract_strided_slice %63 {offsets = [0, 384], sizes = [4, 128], strides = [1, 1]} : vector<4x512xf32> to vector<4x128xf32>
      %79 = arith.negf %78 : vector<4x128xf32>
      %80 = math.exp %79 : vector<4x128xf32>
      %cst_43 = arith.constant 1.000000e+00 : f32
      %81 = vector.broadcast %cst_43 : f32 to vector<4x128xf32>
      %82 = arith.addf %81, %80 : vector<4x128xf32>
      %83 = arith.divf %81, %82 : vector<4x128xf32>
      %c0_44 = arith.constant 0 : index
      %c0_45 = arith.constant 0 : index
      %84 = vector.load %arg10[%c0_44, %c0_45] : memref<4x128xf32, #tpu.memory_space<vmem>>, vector<4x128xf32>
      %85 = arith.mulf %75, %84 : vector<4x128xf32>
      %86 = arith.mulf %69, %77 : vector<4x128xf32>
      %87 = arith.addf %85, %86 : vector<4x128xf32>
      %88 = math.tanh %87 : vector<4x128xf32>
      %89 = arith.mulf %83, %88 : vector<4x128xf32>
      %c0_46 = arith.constant 0 : index
      %c0_47 = arith.constant 0 : index
      %90 = vector.load %arg10[%c0_46, %c0_47] : memref<4x128xf32, #tpu.memory_space<vmem>>, vector<4x128xf32>
      tpu.vector_store %arg10[%c0_46, %c0_47], %87 {strides = array<i32>} : memref<4x128xf32, #tpu.memory_space<vmem>>, vector<4x128xf32>,
      %c0_48 = arith.constant 0 : index
      %c0_49 = arith.constant 0 : index
      %91 = vector.load %arg9[%c0_48, %c0_49] : memref<4x128xf32, #tpu.memory_space<vmem>>, vector<4x128xf32>
      tpu.vector_store %arg9[%c0_48, %c0_49], %89 {strides = array<i32>} : memref<4x128xf32, #tpu.memory_space<vmem>>, vector<4x128xf32>,
      %92 = arith.truncf %89 : vector<4x128xf32> to vector<4x128xbf16>
      %c0_50 = arith.constant 0 : index
      %c0_51 = arith.constant 0 : index
      %93 = vector.load %arg11[%c0_50, %c0_51] : memref<4x128xbf16, #tpu.memory_space<vmem>>, vector<4x128xbf16>
      tpu.vector_store %arg11[%c0_50, %c0_51], %92 {strides = array<i32>} : memref<4x128xbf16, #tpu.memory_space<vmem>>, vector<4x128xbf16>,
      %cst_52 = arith.constant -1.000000e+30 : f32
      %94 = vector.broadcast %cst_52 : f32 to vector<1x4xf32>
      %c0_53 = arith.constant 0 : index
      %c0_54 = arith.constant 0 : index
      %95 = vector.load %arg13[%c0_53, %c0_54] : memref<1x4xf32, #tpu.memory_space<vmem>>, vector<1x4xf32>
      tpu.vector_store %arg13[%c0_53, %c0_54], %94 {strides = array<i32>} : memref<1x4xf32, #tpu.memory_space<vmem>>, vector<1x4xf32>,
      %cst_55 = arith.constant 0.000000e+00 : f32
      %96 = vector.broadcast %cst_55 : f32 to vector<1x4xf32>
      %c0_56 = arith.constant 0 : index
      %c0_57 = arith.constant 0 : index
      %97 = vector.load %arg14[%c0_56, %c0_57] : memref<1x4xf32, #tpu.memory_space<vmem>>, vector<1x4xf32>
      tpu.vector_store %arg14[%c0_56, %c0_57], %96 {strides = array<i32>} : memref<1x4xf32, #tpu.memory_space<vmem>>, vector<1x4xf32>,
      %cst_58 = arith.constant 0.000000e+00 : f32
      %98 = vector.broadcast %cst_58 : f32 to vector<128x4xf32>
      %c0_59 = arith.constant 0 : index
      %c0_60 = arith.constant 0 : index
      %99 = vector.load %arg15[%c0_59, %c0_60] : memref<128x4xf32, #tpu.memory_space<vmem>>, vector<128x4xf32>
      tpu.vector_store %arg15[%c0_59, %c0_60], %98 {strides = array<i32>} : memref<128x4xf32, #tpu.memory_space<vmem>>, vector<128x4xf32>,
    } else {
    }
    %c0 = arith.constant 0 : index
    %c0_1 = arith.constant 0 : index
    %3 = vector.load %arg2[%c0, %c0_1] : memref<48x128xbf16, #tpu.memory_space<vmem>>, vector<48x128xbf16>
    %4 = tpu.iota {dimensions = array<i32: 1>} : vector<48x4xi32>
    %c0_2 = arith.constant 0 : index
    %c0_3 = arith.constant 0 : index
    %5 = vector.load %arg3[%c0_2, %c0_3] : memref<48x1xi32, #tpu.memory_space<vmem>>, vector<48x1xi32>
    %6 = vector.broadcast %5 : vector<48x1xi32> to vector<48x4xi32>
    %7 = arith.cmpi eq, %6, %4 : vector<48x4xi32>
    %8 = arith.extui %7 : vector<48x4xi1> to vector<48x4xi32>
    %9 = arith.sitofp %8 : vector<48x4xi32> to vector<48x4xf32>
    %10 = arith.truncf %9 : vector<48x4xf32> to vector<48x4xbf16>
    %c0_4 = arith.constant 0 : index
    %c0_5 = arith.constant 0 : index
    %11 = vector.load %arg11[%c0_4, %c0_5] : memref<4x128xbf16, #tpu.memory_space<vmem>>, vector<4x128xbf16>
    "tpu.trace_start"() <{level = 10 : i32, message = "nc,bc->nb"}> : () -> ()
    %cst = arith.constant dense<0.000000e+00> : vector<48x4xf32>
    %12 = tpu.matmul %3, %11, %cst {dimension_numbers = #tpu.dot_dimension_numbers<[1], [1], [0], [0], [0, 0, 1, 0], [], []>} : vector<48x128xbf16>, vector<4x128xbf16>, vector<48x4xf32> -> vector<48x4xf32>
    %cst_6 = arith.constant -1.000000e+30 : f32
    "tpu.trace_stop"() : () -> ()
    %13 = vector.broadcast %cst_6 : f32 to vector<48x4xf32>
    %14 = arith.select %7, %12, %13 : vector<48x4xi1>, vector<48x4xf32>
    %cst_7 = arith.constant dense<0xFF800000> : vector<4xf32>
    %15 = vector.multi_reduction <maximumf>, %14, %cst_7 [0] : vector<48x4xf32> to vector<4xf32>
    %16 = vector.shape_cast %15 : vector<4xf32> to vector<1x4xf32>
    %c0_8 = arith.constant 0 : index
    %c0_9 = arith.constant 0 : index
    %17 = vector.load %arg13[%c0_8, %c0_9] : memref<1x4xf32, #tpu.memory_space<vmem>>, vector<1x4xf32>
    %18 = arith.maximumf %17, %16 : vector<1x4xf32>
    %19 = arith.subf %17, %18 : vector<1x4xf32>
    %20 = math.exp %19 : vector<1x4xf32>
    %21 = vector.broadcast %18 : vector<1x4xf32> to vector<48x4xf32>
    %22 = arith.subf %12, %21 : vector<48x4xf32>
    %cst_10 = arith.constant 0.000000e+00 : f32
    %23 = vector.broadcast %cst_10 : f32 to vector<48x4xf32>
    %24 = arith.select %7, %22, %23 : vector<48x4xi1>, vector<48x4xf32>
    %cst_11 = arith.constant dense<0.000000e+00> : vector<48xf32>
    %25 = vector.multi_reduction <add>, %24, %cst_11 [1] : vector<48x4xf32> to vector<48xf32>
    %26 = vector.shape_cast %25 : vector<48xf32> to vector<48x1xf32>
    %27 = math.exp %26 : vector<48x1xf32>
    %cst_12 = arith.constant 0.000000e+00 : f32
    %28 = vector.shape_cast %27 : vector<48x1xf32> to vector<48x1xf32>
    %29 = vector.broadcast %28 : vector<48x1xf32> to vector<48x4xf32>
    %30 = vector.broadcast %cst_12 : f32 to vector<48x4xf32>
    %31 = arith.select %7, %29, %30 : vector<48x4xi1>, vector<48x4xf32>
    %cst_13 = arith.constant dense<0.000000e+00> : vector<4xf32>
    %32 = vector.multi_reduction <add>, %31, %cst_13 [0] : vector<48x4xf32> to vector<4xf32>
    %33 = vector.shape_cast %32 : vector<4xf32> to vector<1x4xf32>
    %c0_14 = arith.constant 0 : index
    %c0_15 = arith.constant 0 : index
    %34 = vector.load %arg13[%c0_14, %c0_15] : memref<1x4xf32, #tpu.memory_space<vmem>>, vector<1x4xf32>
    tpu.vector_store %arg13[%c0_14, %c0_15], %18 {strides = array<i32>} : memref<1x4xf32, #tpu.memory_space<vmem>>, vector<1x4xf32>,
    %c0_16 = arith.constant 0 : index
    %c0_17 = arith.constant 0 : index
    %35 = vector.load %arg14[%c0_16, %c0_17] : memref<1x4xf32, #tpu.memory_space<vmem>>, vector<1x4xf32>
    %36 = arith.mulf %35, %20 : vector<1x4xf32>
    %37 = arith.addf %36, %33 : vector<1x4xf32>
    %c0_18 = arith.constant 0 : index
    %c0_19 = arith.constant 0 : index
    %38 = vector.load %arg14[%c0_18, %c0_19] : memref<1x4xf32, #tpu.memory_space<vmem>>, vector<1x4xf32>
    tpu.vector_store %arg14[%c0_18, %c0_19], %37 {strides = array<i32>} : memref<1x4xf32, #tpu.memory_space<vmem>>, vector<1x4xf32>,
    %39 = arith.truncf %27 : vector<48x1xf32> to vector<48x1xbf16>
    %40 = vector.broadcast %39 : vector<48x1xbf16> to vector<48x128xbf16>
    %41 = arith.mulf %40, %3 : vector<48x128xbf16>
    "tpu.trace_start"() <{level = 10 : i32, message = "nc,nb->cb"}> : () -> ()
    %cst_20 = arith.constant dense<0.000000e+00> : vector<128x4xf32>
    %42 = tpu.matmul %41, %10, %cst_20 {dimension_numbers = #tpu.dot_dimension_numbers<[0], [0], [1], [1], [0, 1, 1, 1], [], []>} : vector<48x128xbf16>, vector<48x4xbf16>, vector<128x4xf32> -> vector<128x4xf32>
    "tpu.trace_stop"() : () -> ()
    %c0_21 = arith.constant 0 : index
    %c0_22 = arith.constant 0 : index
    %43 = vector.load %arg15[%c0_21, %c0_22] : memref<128x4xf32, #tpu.memory_space<vmem>>, vector<128x4xf32>
    %44 = vector.broadcast %20 : vector<1x4xf32> to vector<128x4xf32>
    %45 = arith.mulf %43, %44 : vector<128x4xf32>
    %46 = arith.addf %45, %42 : vector<128x4xf32>
    %c0_23 = arith.constant 0 : index
    %c0_24 = arith.constant 0 : index
    %47 = vector.load %arg15[%c0_23, %c0_24] : memref<128x4xf32, #tpu.memory_space<vmem>>, vector<128x4xf32>
    tpu.vector_store %arg15[%c0_23, %c0_24], %46 {strides = array<i32>} : memref<128x4xf32, #tpu.memory_space<vmem>>, vector<128x4xf32>,
    %c0_i32_25 = arith.constant 0 : i32
    %48 = arith.cmpi eq, %arg1, %c0_i32_25 : i32
    %49 = arith.extui %48 : i1 to i32
    %c0_i32_26 = arith.constant 0 : i32
    %50 = arith.cmpi ne, %49, %c0_i32_26 : i32
    scf.if %50 {
      %c0_27 = arith.constant 0 : index
      %c0_28 = arith.constant 0 : index
      %51 = vector.load %arg14[%c0_27, %c0_28] : memref<1x4xf32, #tpu.memory_space<vmem>>, vector<1x4xf32>
      %cst_29 = arith.constant 1.000000e-16 : f32
      %52 = vector.broadcast %cst_29 : f32 to vector<1x4xf32>
      %53 = arith.addf %51, %52 : vector<1x4xf32>
      %cst_30 = arith.constant 1.000000e+00 : f32
      %54 = vector.broadcast %cst_30 : f32 to vector<1x4xf32>
      %55 = arith.divf %54, %53 : vector<1x4xf32>
      %c0_31 = arith.constant 0 : index
      %c0_32 = arith.constant 0 : index
      %56 = vector.load %arg15[%c0_31, %c0_32] : memref<128x4xf32, #tpu.memory_space<vmem>>, vector<128x4xf32>
      %57 = vector.broadcast %55 : vector<1x4xf32> to vector<128x4xf32>
      %58 = arith.mulf %56, %57 : vector<128x4xf32>
      %c0_33 = arith.constant 0 : index
      %c0_34 = arith.constant 0 : index
      %59 = vector.load %arg12[%c0_33, %c0_34] : memref<128x4xf32, #tpu.memory_space<vmem>>, vector<128x4xf32>
      tpu.vector_store %arg12[%c0_33, %c0_34], %58 {strides = array<i32>} : memref<128x4xf32, #tpu.memory_space<vmem>>, vector<128x4xf32>,
      %c2_i32 = arith.constant 2 : i32
      %60 = arith.cmpi eq, %arg0, %c2_i32 : i32
      %61 = arith.extui %60 : i1 to i32
      %c0_i32_35 = arith.constant 0 : i32
      %62 = arith.cmpi ne, %61, %c0_i32_35 : i32
      scf.if %62 {
        %c0_36 = arith.constant 0 : index
        %c0_37 = arith.constant 0 : index
        %63 = vector.load %arg9[%c0_36, %c0_37] : memref<4x128xf32, #tpu.memory_space<vmem>>, vector<4x128xf32>
        %c0_38 = arith.constant 0 : index
        %c0_39 = arith.constant 0 : index
        %64 = vector.load %arg7[%c0_38, %c0_39] : memref<4x128xf32, #tpu.memory_space<vmem>>, vector<4x128xf32>
        tpu.vector_store %arg7[%c0_38, %c0_39], %63 {strides = array<i32>} : memref<4x128xf32, #tpu.memory_space<vmem>>, vector<4x128xf32>,
        %c0_40 = arith.constant 0 : index
        %c0_41 = arith.constant 0 : index
        %65 = vector.load %arg12[%c0_40, %c0_41] : memref<128x4xf32, #tpu.memory_space<vmem>>, vector<128x4xf32>
        %c0_42 = arith.constant 0 : index
        %c0_43 = arith.constant 0 : index
        %66 = vector.load %arg8[%c0_42, %c0_43] : memref<128x4xf32, #tpu.memory_space<vmem>>, vector<128x4xf32>
        tpu.vector_store %arg8[%c0_42, %c0_43], %65 {strides = array<i32>} : memref<128x4xf32, #tpu.memory_space<vmem>>, vector<128x4xf32>,
      } else {
      }
    } else {
    }
    return
  }
  func.func @transform_0(%arg0: i32, %arg1: i32) -> (i32, i32) {
    %c0_i32 = arith.constant 0 : i32
    %c0_i32_0 = arith.constant 0 : i32
    return %arg1, %c0_i32 : i32, i32
  }
  func.func @transform_1(%arg0: i32, %arg1: i32) -> (i32, i32) {
    %c0_i32 = arith.constant 0 : i32
    %c0_i32_0 = arith.constant 0 : i32
    return %arg1, %c0_i32 : i32, i32
  }
  func.func @transform_2(%arg0: i32, %arg1: i32) -> (i32, i32) {
    %c0_i32 = arith.constant 0 : i32
    %c0_i32_0 = arith.constant 0 : i32
    %c0_i32_1 = arith.constant 0 : i32
    return %c0_i32, %c0_i32_0 : i32, i32
  }
  func.func @transform_3(%arg0: i32, %arg1: i32) -> (i32, i32) {
    %c0_i32 = arith.constant 0 : i32
    %c0_i32_0 = arith.constant 0 : i32
    %c0_i32_1 = arith.constant 0 : i32
    return %c0_i32, %c0_i32_0 : i32, i32
  }
  func.func @transform_4(%arg0: i32, %arg1: i32) -> (i32, i32) {
    %c0_i32 = arith.constant 0 : i32
    %c0_i32_0 = arith.constant 0 : i32
    %c0_i32_1 = arith.constant 0 : i32
    return %c0_i32, %c0_i32_0 : i32, i32
  }
  func.func @transform_5(%arg0: i32, %arg1: i32) -> (i32, i32) {
    %c0_i32 = arith.constant 0 : i32
    %c0_i32_0 = arith.constant 0 : i32
    %c0_i32_1 = arith.constant 0 : i32
    return %c0_i32, %c0_i32_0 : i32, i32
  }
  func.func @transform_6(%arg0: i32, %arg1: i32) -> (i32, i32) {
    %c0_i32 = arith.constant 0 : i32
    %c0_i32_0 = arith.constant 0 : i32
    %c0_i32_1 = arith.constant 0 : i32
    return %c0_i32, %c0_i32_0 : i32, i32
  }
}

</mosaic_0001>

<bundles_post_ra>
// kernel: tpu_custom_call.1
= control target key start
LH: loop header
LB: loop body
LE: loop exit
PB: predicated region body
PF: predicated region fallthrough
CT: control target
= control target key end

     0   :  { %12 = vsyncpa [#allocation10], 0  ;;  %s2517_s0 = inlined_call_operand.vmem [shape: bf16[48,128], index: 0, kind: input, shape index: {}]   ;;  %s2518_s1 = inlined_call_operand.vmem [shape: s32[48,1], index: 1, kind: input, shape index: {}]   ;;  %s2519_s2 = inlined_call_operand.hbm [shape: f32[128,512], index: 2, kind: input, shape index: {}]   ;;  %s2520_s3 = inlined_call_operand.hbm [shape: f32[128,512], index: 3, kind: input, shape index: {}]   ;;  %s2521_s4 = inlined_call_operand.vmem [shape: f32[1,512], index: 4, kind: input, shape index: {}]   ;;  %s2522_s5 = inlined_call_operand.hbm [shape: f32[4,128], index: 5, kind: output, shape index: {0}]   ;;  %s2523_s6 = inlined_call_operand.vmem [shape: f32[128,4], index: 6, kind: output, shape index: {1}]  }
   0x1   :  { %13 = vsyncpa [#allocation13], 0 }
   0x2   :  { %14 = vsyncpa [#allocation11], 0  ;;  %s2000_s21 = smov 0   ;;  %s2002_s22 = smov 0  }
   0x3   :  { %s2004_s23 = smov 0  }
   0x4 LB: > { %s1515_s24 = sadd.s32 4294967295, %s1952_s23   ;;  %s32_s25 = sadd.s32 1, %s1948_s22  ;;  %s1952_s23 = sphi %s2004_s23, %s20_s23   ;;  %s1948_s22 = sphi %s2002_s22, %s2534_s22   ;;  %s1944_s21 = sphi %s2000_s21, %s2533_s21  }
   0x5   : > { %p34_p0 = scmp.ge.s32.totalorder %s32_s25, 3  ;;  %p1516_p1 = scmp.ge.s32.totalorder %s1952_s23, 1 }
   0x6   : > { %p194_p2 = scmp.lt.s32.totalorder %s1952_s23, 4  ;;  %p2027_p4 = scmp.eq.s32.totalorder %s1515_s24, 0 }
   0x7   : > { %s2536_s25 = smov (%p34_p0, %s32_s25), 0  ;;  %s1954_s28 = smov [#allocation9]  }
   0x8   : > { %p2021_p3 = pnand %p1516_p1, %p194_p2  ;;  %s224_s29 = sshll.u32 %s1954_s28, 4  ;;  %s225_s29 = int_to_ptr.vmem [resolvable:$true] %s224_s29 }
   0x9   : > { %s2528_s27 = scalar_select %p2027_p4, 1, 0 }
   0xa   : > { %s2527_s26 = scalar_select %p2021_p3, 1, 0 }
   0xb   : > { %p1751_p5 = pneg %p2021_p3  ;;  %s1955_s7 = smov [#allocation12]  }
   0xc   : > { %s237_s8 = sshll.u32 %s1955_s7, 4  ;;  %s1836_s11 = scalar_lea.hbm %s2519_s2, 8192  ;;  %s2039_s8 = int_to_ptr.vmem [resolvable:$true] %s237_s8 }
   0xd   : > { %p2035_p6 = pnand %p2027_p4, %p1751_p5  ;;  %p1837_p7 = scmp.ne.s32.totalorder %s2519_s2, %s1836_s11 }
   0xe   : > { %p1843_p11 = scmp.lt.u32.totalorder %s1836_s11, %s2519_s2 }
   0xf   : > { %p1838_p8 = pneg %p2035_p6 }
  0x11   : > { %p1839_p9 = pnand %p1838_p8, %p1837_p7 }
  0x13   : > { %p1840_p10 = pneg %p1839_p9 }
  0x15   : > { %p1845_p12 = pnand %p1843_p11, %p1840_p10 }
  0x17   : > { %1848 = shalt.err (!%p1845_p12)
}
  0x18   : > { %s1849_s16 = scalar_lea.vmem %s225_s29, 8192  ;;  %p1857_p2 = scmp.lt.s32.totalorder %s225_s29, %s225_s29 }
  0x19   : > { %p1850_p13 = scmp.ne.s32.totalorder %s225_s29, %s1849_s16  ;;  %p1858_p5 = scmp.lt.s32.totalorder %s1849_s16, %s1849_s16 }
  0x1b   : > { %p1852_p0 = pnand %p1850_p13, %p1838_p8  ;;  %p1859_p4 = por %p1858_p5, %p1857_p2 }
  0x1d   : > { %p1853_p1 = pneg %p1852_p0 }
  0x1f   : > { %p1860_p3 = pnand %p1859_p4, %p1853_p1 }
  0x21   : > { %1863 = shalt.err (!%p1860_p3)
}
  0x22   : > { %s1956_s17 = smov 512   ;;  %s1957_s18 = smov 32  }
  0x23   : > { %1754 = dma.hbm_to_vmem [thread:$0]  (!%p2035_p6), %s2519_s2, 8192, %s225_s29, [#allocation10], %s1956_s17, %s1956_s17, %s1957_s18  }
  0x24   : > { %s1864_s9 = scalar_lea.hbm %s2520_s3, 8192 }
  0x25   : > { %p1865_p7 = scmp.ne.s32.totalorder %s2520_s3, %s1864_s9  ;;  %p1871_p9 = scmp.lt.u32.totalorder %s1864_s9, %s2520_s3 }
  0x27   : > { %p1867_p3 = pnand %p1865_p7, %p1838_p8 }
  0x29   : > { %p1868_p4 = pneg %p1867_p3 }
  0x2b   : > { %p1873_p10 = pnand %p1871_p9, %p1868_p4 }
  0x2d   : > { %1876 = shalt.err (!%p1873_p10)
}
  0x2e   : > { %s1877_s29 = scalar_lea.vmem %s2039_s8, 8192  ;;  %p1885_p0 = scmp.lt.s32.totalorder %s2039_s8, %s2039_s8 }
  0x2f   : > { %p1878_p11 = scmp.ne.s32.totalorder %s2039_s8, %s1877_s29  ;;  %p1886_p1 = scmp.lt.s32.totalorder %s1877_s29, %s1877_s29 }
  0x31   : > { %p1880_p12 = pnand %p1878_p11, %p1838_p8  ;;  %p1887_p2 = por %p1886_p1, %p1885_p0 }
  0x33   : > { %p1881_p13 = pneg %p1880_p12 }
  0x35   : > { %p1888_p5 = pnand %p1887_p2, %p1881_p13 }
  0x37   : > { %1891 = shalt.err (!%p1888_p5)
}
  0x38   : > { %1757 = dma.hbm_to_vmem [thread:$0]  (!%p2035_p6), %s2520_s3, 8192, %s2039_s8, [#allocation13], %s1956_s17, %s1956_s17, %s1957_s18  }
  0x39   : > { %p2530_p7 = scmp.ne.s32.totalorder %s2527_s26, 0 }
  0x3a   : > { %p2531_p3 = scmp.ne.s32.totalorder (!%p2530_p7), %s2528_s27, 0 }
  0x3b   : > { %256 = sbr.rel (%p2530_p7) target bundleno = 1335 (0x537), region = 40 }
  0x42   : > { %1931 = dma.done.wait (%p2531_p3), [#allocation10], 8192  }
  0x43   : > { %1933 = vsyncadd (%p2531_p3), [#allocation10], 4294959104 }
  0x44   : > { %1935 = dma.done.wait (%p2531_p3), [#allocation13], 8192  }
  0x45   : > { %1937 = vsyncadd (%p2531_p3), [#allocation13], 4294959104  ;;  %p1524_p8 = scmp.ne.s32.totalorder %s1944_s21, 0 }
  0x46   : > { %vm313_vm0 = vcmask (!%p1524_p8), 31744   ;;  %v1958_v0 = vmov (!%p1524_p8), 0.0  }
  0x47   : > { %310 = sbr.rel (%p1524_p8) target bundleno = 80 (0x50), region = 56  ;;  %311 = vst [vmem:[#allocation2] sm:$0xf] (!%p1524_p8), %v1958_v0  ;;  %312 = vst [vmem:[#allocation3] sm:$0xf] (!%p1524_p8), %v1958_v0 }
  0x48   : > { %314 = vst.msk [vmem:[#allocation5] sm:$0xff] (!%p1524_p8), %vm313_vm0, %v1958_v0  ;;  %315 = vst.msk [vmem:[#allocation5 + $0x8] sm:$0xff] (!%p1524_p8), %vm313_vm0, %v1958_v0 }
  0x49   : > { %316 = vst.msk [vmem:[#allocation5 + $0x10] sm:$0xff] (!%p1524_p8), %vm313_vm0, %v1958_v0  ;;  %317 = vst.msk [vmem:[#allocation5 + $0x18] sm:$0xff] (!%p1524_p8), %vm313_vm0, %v1958_v0 }
  0x4a   : > { %318 = vst.msk [vmem:[#allocation5 + $0x20] sm:$0xff] (!%p1524_p8), %vm313_vm0, %v1958_v0  ;;  %319 = vst.msk [vmem:[#allocation5 + $0x28] sm:$0xff] (!%p1524_p8), %vm313_vm0, %v1958_v0 }
  0x4b   : > { %320 = vst.msk [vmem:[#allocation5 + $0x30] sm:$0xff] (!%p1524_p8), %vm313_vm0, %v1958_v0  ;;  %321 = vst.msk [vmem:[#allocation5 + $0x38] sm:$0xff] (!%p1524_p8), %vm313_vm0, %v1958_v0 }
  0x4c   : > { %322 = vst.msk [vmem:[#allocation5 + $0x40] sm:$0xff] (!%p1524_p8), %vm313_vm0, %v1958_v0  ;;  %323 = vst.msk [vmem:[#allocation5 + $0x48] sm:$0xff] (!%p1524_p8), %vm313_vm0, %v1958_v0 }
  0x4d   : > { %324 = vst.msk [vmem:[#allocation5 + $0x50] sm:$0xff] (!%p1524_p8), %vm313_vm0, %v1958_v0  ;;  %325 = vst.msk [vmem:[#allocation5 + $0x58] sm:$0xff] (!%p1524_p8), %vm313_vm0, %v1958_v0 }
  0x4e   : > { %326 = vst.msk [vmem:[#allocation5 + $0x60] sm:$0xff] %vm313_vm0, %v1958_v0  ;;  %327 = vst.msk [vmem:[#allocation5 + $0x68] sm:$0xff] %vm313_vm0, %v1958_v0 }
  0x4f   : > { %328 = vst.msk [vmem:[#allocation5 + $0x70] sm:$0xff] %vm313_vm0, %v1958_v0  ;;  %329 = vst.msk [vmem:[#allocation5 + $0x78] sm:$0xff] %vm313_vm0, %v1958_v0 }
  0x50 PF: > { %v1959_v2 = vmov 0.0   ;;  %v412_v5 = vld [vmem:[#allocation12 + $0x8] sm:$0xff]  ;;  %v414_v8 = vld [vmem:[#allocation12 + $0x18] sm:$0xff]  ;;  %v411_v10 = vld [vmem:[#allocation12] sm:$0xff]  ;;  %vm1960_vm1 = vmmov 0   ;;  %vm849_vm2 = vcmask 31744  }
  0x51   : > { %v395_v1 = vld [vmem:[#allocation5] sm:$0xff]  ;;  %571 = vmatprep.mubr.f32.mxu0 %v1959_v2  ;;  %v396_v3 = vld [vmem:[#allocation5 + $0x8] sm:$0xff]  ;;  %642 = vmatprep.mubr.f32.mxu1 %v1959_v2  ;;  %v413_v13 = vld [vmem:[#allocation12 + $0x10] sm:$0xff]  ;;  %850 = vst.msk [vmem:[#allocation8] sm:$0xff] %vm849_vm2, %v1959_v2  ;;  %vm846_vm12 = vcmask 24576   ;;  %vm1123_vm13 = vcmask 392192  }
  0x52   : > { %475 = vxpose.xlu0.b32.start [1/16] (narrow) %v395_v1, 8  ;;  %v397_v4 = vld [vmem:[#allocation5 + $0x10] sm:$0xff]  ;;  %v418_v9 = vld [vmem:[#allocation12 + $0x38] sm:$0xff]  ;;  %v415_v12 = vld [vmem:[#allocation12 + $0x20] sm:$0xff]  ;;  %851 = vst.msk [vmem:[#allocation8 + $0x8] sm:$0xff] %vm849_vm2, %v1959_v2  ;;  %p1551_p6 = scmp.ne.s32.totalorder %s1944_s21, 2 }
  0x53   : > { %v416_v6 = vld [vmem:[#allocation12 + $0x28] sm:$0xff]  ;;  %v1639_v11 = vpack.c.bf16 %v418_v9, %v414_v8  ;;  %v417_v14 = vld [vmem:[#allocation12 + $0x30] sm:$0xff]  ;;  %v1609_v16 = vpack.c.bf16 %v415_v12, %v411_v10  ;;  %v422_v20 = vld [vmem:[#allocation12 + $0x58] sm:$0xff]  ;;  %852 = vst.msk [vmem:[#allocation8 + $0x10] sm:$0xff] %vm849_vm2, %v1959_v2 }
  0x54   : > { %v1607_v7 = vpack.c.bf16 %v416_v6, %v412_v5  ;;  %v398_v15 = vld [vmem:[#allocation5 + $0x18] sm:$0xff]  ;;  %v1641_v17 = vpack.c.bf16 %v417_v14, %v413_v13  ;;  %v420_v18 = vld [vmem:[#allocation12 + $0x48] sm:$0xff]  ;;  %v419_v23 = vld [vmem:[#allocation12 + $0x40] sm:$0xff]  ;;  %853 = vst.msk [vmem:[#allocation8 + $0x18] sm:$0xff] %vm849_vm2, %v1959_v2 }
  0x55   : > { %v424_v19 = vld [vmem:[#allocation12 + $0x68] sm:$0xff]  ;;  %1640 = vmatprep.subr.bf16.mxu1 %v1639_v11  ;;  %v426_v22 = vld [vmem:[#allocation12 + $0x78] sm:$0xff]  ;;  %v423_v24 = vld [vmem:[#allocation12 + $0x60] sm:$0xff]  ;;  %854 = vst.msk [vmem:[#allocation8 + $0x20] sm:$0xff] %vm849_vm2, %v1959_v2 }
  0x56   : > { %476 = vxpose.xlu0.b32.cont [2/16] (narrow) %v396_v3, 8  ;;  %1608 = vmatprep.subr.bf16.mxu0 %v1607_v7  ;;  %v1611_v21 = vpack.c.bf16 %v424_v19, %v420_v18  ;;  %v1643_v25 = vpack.c.bf16 %v426_v22, %v422_v20  ;;  %v1613_v26 = vpack.c.bf16 %v423_v24, %v419_v23  ;;  %v421_v27 = vld [vmem:[#allocation12 + $0x50] sm:$0xff]  ;;  %v428_v29 = vld [vmem:[#allocation12 + $0x88] sm:$0xff]  ;;  %v430_v32 = vld [vmem:[#allocation12 + $0x98] sm:$0xff] }
  0x57   : > { %1610 = vmatpush1.bf16.msra.mxu0 %v1609_v16  ;;  %1642 = vmatpush1.bf16.msra.mxu1 %v1641_v17  ;;  %v425_v28 = vld [vmem:[#allocation12 + $0x70] sm:$0xff]  ;;  %v432_v31 = vld [vmem:[#allocation12 + $0xa8] sm:$0xff]  ;;  %v434_v33 = vld [vmem:[#allocation12 + $0xb8] sm:$0xff]  ;;  %855 = vst.msk [vmem:[#allocation8 + $0x28] sm:$0xff] %vm849_vm2, %v1959_v2 }
  0x58   : > { %1612 = vmatprep.subr.bf16.mxu0 %v1611_v21  ;;  %v1645_v30 = vpack.c.bf16 %v425_v28, %v421_v27  ;;  %v399_v34 = vld [vmem:[#allocation5 + $0x20] sm:$0xff]  ;;  %1644 = vmatprep.subr.bf16.mxu1 %v1643_v25  ;;  %v1615_v35 = vpack.c.bf16 %v432_v31, %v428_v29  ;;  %v1647_v36 = vpack.c.bf16 %v434_v33, %v430_v32  ;;  %v429_v39 = vld [vmem:[#allocation12 + $0x90] sm:$0xff]  ;;  %v436_v41 = vld [vmem:[#allocation12 + $0xc8] sm:$0xff] }
  0x59   : > { %v427_v37 = vld [vmem:[#allocation12 + $0x80] sm:$0xff]  ;;  %v433_v40 = vld [vmem:[#allocation12 + $0xb0] sm:$0xff]  ;;  %v440_v42 = vld [vmem:[#allocation12 + $0xe8] sm:$0xff]  ;;  %856 = vst.msk [vmem:[#allocation8 + $0x30] sm:$0xff] %vm849_vm2, %v1959_v2 }
  0x5a   : > { %477 = vxpose.xlu0.b32.cont [3/16] (narrow) %v397_v4, 8  ;;  %v431_v38 = vld [vmem:[#allocation12 + $0xa0] sm:$0xff]  ;;  %v1649_v44 = vpack.c.bf16 %v433_v40, %v429_v39  ;;  %v438_v45 = vld [vmem:[#allocation12 + $0xd8] sm:$0xff]  ;;  %v1619_v48 = vpack.c.bf16 %v440_v42, %v436_v41  ;;  %v437_v51 = vld [vmem:[#allocation12 + $0xd0] sm:$0xff]  ;;  %857 = vst.msk [vmem:[#allocation8 + $0x38] sm:$0xff] %vm849_vm2, %v1959_v2 }
  0x5b   : > { %1614 = vmatpush1.bf16.msra.mxu0 %v1613_v26  ;;  %1646 = vmatpush1.bf16.msra.mxu1 %v1645_v30  ;;  %v1617_v43 = vpack.c.bf16 %v431_v38, %v427_v37  ;;  %v442_v46 = vld [vmem:[#allocation12 + $0xf8] sm:$0xff]  ;;  %v435_v47 = vld [vmem:[#allocation12 + $0xc0] sm:$0xff]  ;;  %v441_v52 = vld [vmem:[#allocation12 + $0xf0] sm:$0xff]  ;;  %858 = vst.msk [vmem:[#allocation8 + $0x40] sm:$0xff] %vm849_vm2, %v1959_v2 }
  0x5c   : > { %1616 = vmatprep.subr.bf16.mxu0 %v1615_v35  ;;  %1648 = vmatprep.subr.bf16.mxu1 %v1647_v36  ;;  %v1651_v49 = vpack.c.bf16 %v442_v46, %v438_v45  ;;  %v439_v50 = vld [vmem:[#allocation12 + $0xe0] sm:$0xff]  ;;  %v444_v53 = vld [vmem:[#allocation12 + $0x108] sm:$0xff]  ;;  %v446_v55 = vld [vmem:[#allocation12 + $0x118] sm:$0xff]  ;;  %v1653_v59 = vpack.c.bf16 %v441_v52, %v437_v51  ;;  %859 = vst.msk [vmem:[#allocation8 + $0x48] sm:$0xff] %vm849_vm2, %v1959_v2 }
  0x5d   : > { %v448_v54 = vld [vmem:[#allocation12 + $0x128] sm:$0xff]  ;;  %v450_v56 = vld [vmem:[#allocation12 + $0x138] sm:$0xff]  ;;  %v1621_v58 = vpack.c.bf16 %v439_v50, %v435_v47  ;;  %v443_v60 = vld [vmem:[#allocation12 + $0x100] sm:$0xff]  ;;  %860 = vst.msk [vmem:[#allocation8 + $0x50] sm:$0xff] %vm849_vm2, %v1959_v2 }
  0x5e   : > { %478 = vxpose.xlu0.b32.cont [4/16] (narrow) %v398_v15, 8  ;;  %v400_v57 = vld [vmem:[#allocation5 + $0x28] sm:$0xff]  ;;  %v1623_v62 = vpack.c.bf16 %v448_v54, %v444_v53  ;;  %v1655_v63 = vpack.c.bf16 %v450_v56, %v446_v55  ;;  %v445_v0 = vld [vmem:[#allocation12 + $0x110] sm:$0xff]  ;;  %v454_v5 = vld [vmem:[#allocation12 + $0x158] sm:$0xff]  ;;  %861 = vst.msk [vmem:[#allocation8 + $0x58] sm:$0xff] %vm849_vm2, %v1959_v2 }
  0x5f   : > { %1618 = vmatpush1.bf16.msra.mxu0 %v1617_v43  ;;  %1650 = vmatpush1.bf16.msra.mxu1 %v1649_v44  ;;  %v447_v61 = vld [vmem:[#allocation12 + $0x120] sm:$0xff]  ;;  %v449_v1 = vld [vmem:[#allocation12 + $0x130] sm:$0xff]  ;;  %v452_v3 = vld [vmem:[#allocation12 + $0x148] sm:$0xff]  ;;  %862 = vst.msk [vmem:[#allocation8 + $0x60] sm:$0xff] %vm849_vm2, %v1959_v2 }
  0x60   : > { %1620 = vmatprep.subr.bf16.mxu0 %v1619_v48  ;;  %1652 = vmatprep.subr.bf16.mxu1 %v1651_v49  ;;  %v456_v4 = vld [vmem:[#allocation12 + $0x168] sm:$0xff]  ;;  %v458_v6 = vld [vmem:[#allocation12 + $0x178] sm:$0xff]  ;;  %v1625_v8 = vpack.c.bf16 %v447_v61, %v443_v60  ;;  %v1657_v9 = vpack.c.bf16 %v449_v1, %v445_v0  ;;  %v451_v10 = vld [vmem:[#allocation12 + $0x140] sm:$0xff]  ;;  %863 = vst.msk [vmem:[#allocation8 + $0x68] sm:$0xff] %vm849_vm2, %v1959_v2 }
  0x61   : > { %v401_v7 = vld [vmem:[#allocation5 + $0x30] sm:$0xff]  ;;  %v455_v11 = vld [vmem:[#allocation12 + $0x160] sm:$0xff]  ;;  %v1627_v12 = vpack.c.bf16 %v456_v4, %v452_v3  ;;  %v1659_v13 = vpack.c.bf16 %v458_v6, %v454_v5  ;;  %v462_v18 = vld [vmem:[#allocation12 + $0x198] sm:$0xff]  ;;  %864 = vst.msk [vmem:[#allocation8 + $0x70] sm:$0xff] %vm849_vm2, %v1959_v2 }
  0x62   : > { %479 = vxpose.xlu0.b32.cont [5/16] (narrow) %v399_v34, 8  ;;  %v453_v14 = vld [vmem:[#allocation12 + $0x150] sm:$0xff]  ;;  %v460_v16 = vld [vmem:[#allocation12 + $0x188] sm:$0xff]  ;;  %v466_v19 = vld [vmem:[#allocation12 + $0x1b8] sm:$0xff]  ;;  %v1629_v21 = vpack.c.bf16 %v455_v11, %v451_v10  ;;  %865 = vst.msk [vmem:[#allocation8 + $0x78] sm:$0xff] %vm849_vm2, %v1959_v2 }
  0x63   : > { %1622 = vmatpush1.bf16.msra.mxu0 %v1621_v58  ;;  %1654 = vmatpush1.bf16.msra.mxu1 %v1653_v59  ;;  %v457_v15 = vld [vmem:[#allocation12 + $0x170] sm:$0xff]  ;;  %v464_v17 = vld [vmem:[#allocation12 + $0x1a8] sm:$0xff]  ;;  %v459_v23 = vld [vmem:[#allocation12 + $0x180] sm:$0xff]  ;;  %v1663_v26 = vpack.c.bf16 %v466_v19, %v462_v18  ;;  %848 = vst.msk [vmem:[#allocation7] sm:$0x1] %vm846_vm12, %v1959_v2 }
  0x64   : > { %1624 = vmatprep.subr.bf16.mxu0 %v1623_v62  ;;  %1656 = vmatprep.subr.bf16.mxu1 %v1655_v63  ;;  %v402_v20 = vld [vmem:[#allocation5 + $0x38] sm:$0xff]  ;;  %v1661_v22 = vpack.c.bf16 %v457_v15, %v453_v14  ;;  %v463_v24 = vld [vmem:[#allocation12 + $0x1a0] sm:$0xff]  ;;  %v1631_v25 = vpack.c.bf16 %v464_v17, %v460_v16  ;;  %v468_v29 = vld [vmem:[#allocation12 + $0x1c8] sm:$0xff] }
  0x65   : > { %v461_v27 = vld [vmem:[#allocation12 + $0x190] sm:$0xff]  ;;  %v472_v30 = vld [vmem:[#allocation12 + $0x1e8] sm:$0xff]  ;;  %v470_v31 = vld [vmem:[#allocation12 + $0x1d8] sm:$0xff]  ;;  %v1633_v34 = vpack.c.bf16 %v463_v24, %v459_v23 }
  0x66   : > { %480 = vxpose.xlu0.b32.cont [6/16] (narrow) %v400_v57, 8  ;;  %v465_v28 = vld [vmem:[#allocation12 + $0x1b0] sm:$0xff]  ;;  %v474_v32 = vld [vmem:[#allocation12 + $0x1f8] sm:$0xff]  ;;  %v467_v36 = vld [vmem:[#allocation12 + $0x1c0] sm:$0xff]  ;;  %v1635_v38 = vpack.c.bf16 %v472_v30, %v468_v29 }
  0x67   : > { %1626 = vmatpush1.bf16.msra.mxu0 %v1625_v8  ;;  %1658 = vmatpush1.bf16.msra.mxu1 %v1657_v9  ;;  %v403_v33 = vld [vmem:[#allocation5 + $0x40] sm:$0xff]  ;;  %v1665_v35 = vpack.c.bf16 %v465_v28, %v461_v27  ;;  %v1667_v39 = vpack.c.bf16 %v474_v32, %v470_v31  ;;  %v469_v40 = vld [vmem:[#allocation12 + $0x1d0] sm:$0xff]  ;;  %v332_v42 = vld [vmem:[#allocation9 + $0x8] sm:$0xff] }
  0x68   : > { %1628 = vmatprep.subr.bf16.mxu0 %v1627_v12  ;;  %1660 = vmatprep.subr.bf16.mxu1 %v1659_v13  ;;  %v471_v37 = vld [vmem:[#allocation12 + $0x1e0] sm:$0xff]  ;;  %v473_v41 = vld [vmem:[#allocation12 + $0x1f0] sm:$0xff]  ;;  %v336_v43 = vld [vmem:[#allocation9 + $0x28] sm:$0xff] }
  0x69   : > { %v334_v44 = vld [vmem:[#allocation9 + $0x18] sm:$0xff]  ;;  %v404_v46 = vld [vmem:[#allocation5 + $0x48] sm:$0xff]  ;;  %v1637_v47 = vpack.c.bf16 %v471_v37, %v467_v36  ;;  %v1669_v48 = vpack.c.bf16 %v473_v41, %v469_v40  ;;  %v1671_v49 = vpack.c.bf16 %v336_v43, %v332_v42  ;;  %v405_v51 = vld [vmem:[#allocation5 + $0x50] sm:$0xff] }
  0x6a   : > { %481 = vxpose.xlu0.b32.cont [7/16] (narrow) %v401_v7, 8  ;;  %v338_v45 = vld [vmem:[#allocation9 + $0x38] sm:$0xff]  ;;  %v408_v54 = vld [vmem:[#allocation5 + $0x68] sm:$0xff]  ;;  %v409_v55 = vld [vmem:[#allocation5 + $0x70] sm:$0xff] }
  0x6b   : > { %1630 = vmatpush1.bf16.msra.mxu0 %v1629_v21  ;;  %1662 = vmatpush1.bf16.msra.mxu1 %v1661_v22  ;;  %v1703_v50 = vpack.c.bf16 %v338_v45, %v334_v44  ;;  %v406_v52 = vld [vmem:[#allocation5 + $0x58] sm:$0xff]  ;;  %v407_v53 = vld [vmem:[#allocation5 + $0x60] sm:$0xff]  ;;  %v340_v61 = vld [vmem:[#allocation9 + $0x48] sm:$0xff] }
  0x6c   : > { %1632 = vmatprep.subr.bf16.mxu0 %v1631_v25  ;;  %1664 = vmatprep.subr.bf16.mxu1 %v1663_v26  ;;  %v410_v56 = vld [vmem:[#allocation5 + $0x78] sm:$0xff]  ;;  %v331_v57 = vld [vmem:[#allocation9] sm:$0xff]  ;;  %v344_v62 = vld [vmem:[#allocation9 + $0x68] sm:$0xff] }
  0x6d   : > { %v335_v58 = vld [vmem:[#allocation9 + $0x20] sm:$0xff]  ;;  %v333_v59 = vld [vmem:[#allocation9 + $0x10] sm:$0xff]  ;;  %v342_v63 = vld [vmem:[#allocation9 + $0x58] sm:$0xff]  ;;  %v1675_v6 = vpack.c.bf16 %v344_v62, %v340_v61 }
  0x6e   : > { %482 = vxpose.xlu0.b32.cont [8/16] (narrow) %v402_v20, 8  ;;  %v337_v60 = vld [vmem:[#allocation9 + $0x30] sm:$0xff]  ;;  %v346_v0 = vld [vmem:[#allocation9 + $0x78] sm:$0xff]  ;;  %v1673_v1 = vpack.c.bf16 %v335_v58, %v331_v57  ;;  %v339_v4 = vld [vmem:[#allocation9 + $0x40] sm:$0xff] }
  0x6f   : > { %1634 = vmatpush1.bf16.msra.mxu0 %v1633_v34  ;;  %1666 = vmatpush1.bf16.msra.mxu1 %v1665_v35  ;;  %v1705_v3 = vpack.c.bf16 %v337_v60, %v333_v59  ;;  %v343_v5 = vld [vmem:[#allocation9 + $0x60] sm:$0xff]  ;;  %v1707_v7 = vpack.c.bf16 %v346_v0, %v342_v63  ;;  %v341_v8 = vld [vmem:[#allocation9 + $0x50] sm:$0xff]  ;;  %v348_v10 = vld [vmem:[#allocation9 + $0x88] sm:$0xff] }
  0x70   : > { %1636 = vmatprep.subr.bf16.mxu0 %v1635_v38  ;;  %1668 = vmatprep.subr.bf16.mxu1 %v1667_v39  ;;  %v345_v9 = vld [vmem:[#allocation9 + $0x70] sm:$0xff]  ;;  %v352_v12 = vld [vmem:[#allocation9 + $0xa8] sm:$0xff]  ;;  %v350_v13 = vld [vmem:[#allocation9 + $0x98] sm:$0xff]  ;;  %v1677_v15 = vpack.c.bf16 %v343_v5, %v339_v4 }
  0x71   : > { %v354_v14 = vld [vmem:[#allocation9 + $0xb8] sm:$0xff]  ;;  %v1709_v16 = vpack.c.bf16 %v345_v9, %v341_v8  ;;  %v347_v17 = vld [vmem:[#allocation9 + $0x80] sm:$0xff]  ;;  %v1679_v19 = vpack.c.bf16 %v352_v12, %v348_v10  ;;  %v349_v21 = vld [vmem:[#allocation9 + $0x90] sm:$0xff] }
  0x72   : > { %483 = vxpose.xlu0.b32.cont [9/16] (narrow) %v403_v33, 8  ;;  %v351_v18 = vld [vmem:[#allocation9 + $0xa0] sm:$0xff]  ;;  %v1711_v20 = vpack.c.bf16 %v354_v14, %v350_v13  ;;  %v353_v22 = vld [vmem:[#allocation9 + $0xb0] sm:$0xff]  ;;  %v356_v23 = vld [vmem:[#allocation9 + $0xc8] sm:$0xff] }
  0x73   : > { %1638 = vmatpush1.bf16.msra.mxu0 %v1637_v47  ;;  %1670 = vmatpush1.bf16.msra.mxu1 %v1669_v48  ;;  %v360_v24 = vld [vmem:[#allocation9 + $0xe8] sm:$0xff]  ;;  %v358_v25 = vld [vmem:[#allocation9 + $0xd8] sm:$0xff]  ;;  %v1681_v27 = vpack.c.bf16 %v351_v18, %v347_v17  ;;  %v1713_v28 = vpack.c.bf16 %v353_v22, %v349_v21  ;;  %v355_v29 = vld [vmem:[#allocation9 + $0xc0] sm:$0xff] }
  0x74   : > { %1672 = vmatprep.subr.bf16.mxu0 %v1671_v49  ;;  %1704 = vmatprep.subr.bf16.mxu1 %v1703_v50  ;;  %v362_v26 = vld [vmem:[#allocation9 + $0xf8] sm:$0xff]  ;;  %v359_v30 = vld [vmem:[#allocation9 + $0xe0] sm:$0xff]  ;;  %v1683_v31 = vpack.c.bf16 %v360_v24, %v356_v23  ;;  %v357_v33 = vld [vmem:[#allocation9 + $0xd0] sm:$0xff]  ;;  %v1961_v24 = vmov 0  }
  0x75   : > { %v1715_v32 = vpack.c.bf16 %v362_v26, %v358_v25  ;;  %v361_v34 = vld [vmem:[#allocation9 + $0xf0] sm:$0xff]  ;;  %v364_v35 = vld [vmem:[#allocation9 + $0x108] sm:$0xff]  ;;  %v366_v37 = vld [vmem:[#allocation9 + $0x118] sm:$0xff]  ;;  %v1685_v39 = vpack.c.bf16 %v359_v30, %v355_v29  ;;  %1799 = vset.pattern.permute.xlu1 %v1961_v24  ;;  %v793_v30 = vlaneseq }
  0x76   : > { %484 = vxpose.xlu0.b32.cont [10/16] (narrow) %v404_v46, 8  ;;  %v368_v36 = vld [vmem:[#allocation9 + $0x128] sm:$0xff]  ;;  %v370_v38 = vld [vmem:[#allocation9 + $0x138] sm:$0xff]  ;;  %v1717_v40 = vpack.c.bf16 %v361_v34, %v357_v33  ;;  %v363_v41 = vld [vmem:[#allocation9 + $0x100] sm:$0xff] }
  0x77   : > { %v367_v42 = vld [vmem:[#allocation9 + $0x120] sm:$0xff]  ;;  %v1687_v43 = vpack.c.bf16 %v368_v36, %v364_v35  ;;  %v1719_v44 = vpack.c.bf16 %v370_v38, %v366_v37  ;;  %v365_v45 = vld [vmem:[#allocation9 + $0x110] sm:$0xff]  ;;  %v372_v47 = vld [vmem:[#allocation9 + $0x148] sm:$0xff] }
  0x78   : > { %v369_v46 = vld [vmem:[#allocation9 + $0x130] sm:$0xff]  ;;  %v376_v48 = vld [vmem:[#allocation9 + $0x168] sm:$0xff]  ;;  %v374_v49 = vld [vmem:[#allocation9 + $0x158] sm:$0xff] }
  0x79   : > { %v378_v50 = vld [vmem:[#allocation9 + $0x178] sm:$0xff]  ;;  %v373_v57 = vld [vmem:[#allocation9 + $0x150] sm:$0xff]  ;;  %v380_v59 = vld [vmem:[#allocation9 + $0x188] sm:$0xff] }
  0x7a   : > { %485 = vxpose.xlu0.b32.cont [11/16] (narrow) %v405_v51, 8  ;;  %v1689_v51 = vpack.c.bf16 %v367_v42, %v363_v41  ;;  %v377_v58 = vld [vmem:[#allocation9 + $0x170] sm:$0xff]  ;;  %v384_v60 = vld [vmem:[#allocation9 + $0x1a8] sm:$0xff]  ;;  %v382_v61 = vld [vmem:[#allocation9 + $0x198] sm:$0xff] }
  0x7b   : > { %v386_v62 = vld [vmem:[#allocation9 + $0x1b8] sm:$0xff]  ;;  %v1725_v0 = vpack.c.bf16 %v377_v58, %v373_v57  ;;  %v1695_v4 = vpack.c.bf16 %v384_v60, %v380_v59  ;;  %v388_v8 = vld [vmem:[#allocation9 + $0x1c8] sm:$0xff]  ;;  %v387_v14 = vld [vmem:[#allocation9 + $0x1c0] sm:$0xff] }
  0x7c   : > { %v1727_v5 = vpack.c.bf16 %v386_v62, %v382_v61  ;;  %v392_v9 = vld [vmem:[#allocation9 + $0x1e8] sm:$0xff]  ;;  %v390_v10 = vld [vmem:[#allocation9 + $0x1d8] sm:$0xff]  ;;  %v391_v17 = vld [vmem:[#allocation9 + $0x1e0] sm:$0xff] }
  0x7d   : > { %v389_v18 = vld [vmem:[#allocation9 + $0x1d0] sm:$0xff]  ;;  %v875_v25 = vld [vmem:[%s2518_s1 + $0x8] sm:$0xff]  ;;  %v836_v58 = vld [vmem:[#allocation3] sm:$0xf] }
  0x7e   : > { %486 = vxpose.xlu0.b32.cont [12/16] (narrow) %v406_v52, 8  ;;  %v1721_v52 = vpack.c.bf16 %v369_v46, %v365_v45  ;;  %v330_v22 = vld [vmem:[#allocation2] sm:$0xf]  ;;  %v877_v29 = vld [vmem:[%s2518_s1 + $0x18] sm:$0xff] }
  0x7f   : > { %v874_v23 = vld [vmem:[%s2518_s1] sm:$0xff] }
  0x80   : > { %881 = vperm.xlu1 %1799, %v874_v23   ;;  %v878_v26 = vld [vmem:[%s2518_s1 + $0x20] sm:$0xff] }
  0x81   : > { %v791_v33 = vld [vmem:[%s2521_s4] sm:$0xf] }
  0x82   : > { %487 = vxpose.xlu0.b32.cont [13/16] (narrow) %v407_v53, 8  ;;  %v371_v53 = vld [vmem:[#allocation9 + $0x140] sm:$0xff] }
  0x84   : > { %884 = vperm.xlu1 %1799, %v875_v25  }
  0x86   : > { %488 = vxpose.xlu0.b32.cont [14/16] (narrow) %v408_v54, 8  ;;  %v375_v54 = vld [vmem:[#allocation9 + $0x160] sm:$0xff] }
  0x87   : > { %v1693_v63 = vpack.c.bf16 %v375_v54, %v371_v53 }
  0x88   : > { %893 = vperm.xlu1 %1799, %v878_v26  }
  0x8a   : > { %489 = vxpose.xlu0.b32.cont [15/16] (narrow) %v409_v55, 8  ;;  %v1691_v55 = vpack.c.bf16 %v376_v48, %v372_v47 }
  0x8e   : > { %490 = vxpose.xlu0.b32.end [16/16] (narrow) %v410_v56, 8  ;;  %v1723_v56 = vpack.c.bf16 %v378_v50, %v374_v49 }
  0xb7   : > { %1800 = vset.pattern.permute.xlu0 %v1961_v24 }
  0xd2   : > { %v491_v11 = vpop.trf.xlu0 }
  0xd3   : > { %572 = vmatmul.mubr.f32.vlgmr.msra.gmra.mrb[0].mxu0 %v491_v11  ;;  %643 = vmatmul.mubr.f32.vlgmr.msra.gmra.mrb[0].mxu1 %v491_v11  ;;  %v394_v11 = vld [vmem:[#allocation9 + $0x1f8] sm:$0xff] }
  0xd4   : > { %1674 = vmatpush1.bf16.msra.mxu0 %v1673_v1  ;;  %1706 = vmatpush1.bf16.msra.mxu1 %v1705_v3  ;;  %v379_v1 = vld [vmem:[#allocation9 + $0x180] sm:$0xff] }
  0xd5   : > { %1676 = vmatprep.subr.bf16.mxu0 %v1675_v6  ;;  %1708 = vmatprep.subr.bf16.mxu1 %v1707_v7  ;;  %v383_v3 = vld [vmem:[#allocation9 + $0x1a0] sm:$0xff]  ;;  %v381_v6 = vld [vmem:[#allocation9 + $0x190] sm:$0xff] }
  0xd6   : > { %713 = vmatprep.mubr.f32.mxu0 %v1959_v2  ;;  %784 = vmatprep.mubr.f32.mxu1 %v1959_v2  ;;  %v385_v7 = vld [vmem:[#allocation9 + $0x1b0] sm:$0xff]  ;;  %v1697_v12 = vpack.c.bf16 %v383_v3, %v379_v1 }
  0xd7   : > { %v1729_v13 = vpack.c.bf16 %v385_v7, %v381_v6  ;;  %v2181_v7 = vld [vmem:[%s2517_s0] sm:$0xff]  }
  0xd8   : > { %1678 = vmatpush1.bf16.msra.mxu0 %v1677_v15  ;;  %1710 = vmatpush1.bf16.msra.mxu1 %v1709_v16  ;;  %v1699_v15 = vpack.c.bf16 %v392_v9, %v388_v8  ;;  %v1731_v16 = vpack.c.bf16 %v394_v11, %v390_v10  ;;  %v2189_v8 = vld [vmem:[%s2517_s0 + $0x8] sm:$0xff]   ;;  %v2197_v9 = vld [vmem:[%s2517_s0 + $0x10] sm:$0xff]   ;;  %v2200_v10 = vand.u32 127, %v793_v30 }
  0xd9   : > { %1680 = vmatprep.subr.bf16.mxu0 %v1679_v19  ;;  %1712 = vmatprep.subr.bf16.mxu1 %v1711_v20  ;;  %v393_v19 = vld [vmem:[#allocation9 + $0x1f0] sm:$0xff]  ;;  %v1701_v20 = vpack.c.bf16 %v391_v17, %v387_v14 }
  0xda   : > { %v1733_v21 = vpack.c.bf16 %v393_v19, %v389_v18  ;;  %v1963_v18 = vmov -1e+30  }
  0xdb   : > { %847 = vst.msk [vmem:[#allocation6] sm:$0x1] %vm846_vm12, %v1963_v18 }
  0xdc   : > { %1682 = vmatpush1.bf16.msra.mxu0 %v1681_v27  ;;  %1714 = vmatpush1.bf16.msra.mxu1 %v1713_v28  ;;  %v879_v27 = vld [vmem:[%s2518_s1 + $0x28] sm:$0xff]  ;;  %v876_v28 = vld [vmem:[%s2518_s1 + $0x10] sm:$0xff] }
  0xdd   : > { %1684 = vmatprep.subr.bf16.mxu0 %v1683_v31  ;;  %1716 = vmatprep.subr.bf16.mxu1 %v1715_v32  ;;  %v794_v31 = vshrl.u32 %v793_v30, 7 }
  0xde   : > { %896 = vperm.xlu1 %1799, %v879_v27  }
  0xdf   : > { %v2172_v32 = vsub.s32 0, %v794_v31  ;;  %v799_v34 = vsub.s32 1, %v794_v31  ;;  %v803_v47 = vsub.s32 2, %v794_v31 }
  0xe0   : > { %1686 = vmatpush1.bf16.msra.mxu0 %v1685_v39  ;;  %1718 = vmatpush1.bf16.msra.mxu1 %v1717_v40  ;;  %v807_v39 = vsub.s32 3, %v794_v31 }
  0xe1   : > { %1688 = vmatprep.subr.bf16.mxu0 %v1687_v43  ;;  %1720 = vmatprep.subr.bf16.mxu1 %v1719_v44  ;;  %v796_v35 = vrot.slane %v791_v33, %v2172_v32  ;;  %v800_v36 = vrot.slane %v791_v33, %v799_v34  ;;  %v804_v49 = vrot.slane %v791_v33, %v803_v47 }
  0xe2   : > { %887 = vperm.xlu1 %1799, %v876_v28   ;;  %v808_v46 = vrot.slane %v791_v33, %v807_v39 }
  0xe4   : > { %1690 = vmatpush1.bf16.msra.mxu0 %v1689_v51  ;;  %1722 = vmatpush1.bf16.msra.mxu1 %v1721_v52 }
  0xe5   : > { %1692 = vmatprep.subr.bf16.mxu0 %v1691_v55  ;;  %1724 = vmatprep.subr.bf16.mxu1 %v1723_v56 }
  0xe6   : > { %890 = vperm.xlu1 %1799, %v877_v29  }
  0xe8   : > { %1694 = vmatpush1.bf16.msra.mxu0 %v1693_v63  ;;  %1726 = vmatpush1.bf16.msra.mxu1 %v1725_v0 }
  0xe9   : > { %1696 = vmatprep.subr.bf16.mxu0 %v1695_v4  ;;  %1728 = vmatprep.subr.bf16.mxu1 %v1727_v5 }
  0xec   : > { %1698 = vmatpush1.bf16.msra.mxu0 %v1697_v12  ;;  %1730 = vmatpush1.bf16.msra.mxu1 %v1729_v13  ;;  %v1962_v13 = vmov 1.0|1.0  }
  0xed   : > { %1700 = vmatprep.subr.bf16.mxu0 %v1699_v15  ;;  %1732 = vmatprep.subr.bf16.mxu1 %v1731_v16 }
  0xf0   : > { %1702 = vmatpush1.bf16.msra.mxu0 %v1701_v20  ;;  %1734 = vmatpush1.bf16.msra.mxu1 %v1733_v21 }
  0xf1   : > { %1571 = vmatprep.subr.bf16.mxu0 %v1959_v2 }
  0xf3   : > { %714 = vmatmul.mubr.f32.vlgmr.msra.gmra.mrb[0].mxu0 %v330_v22  ;;  %785 = vmatmul.mubr.f32.vlgmr.msra.gmra.mrb[0].mxu1 %v330_v22 }
  0xf4   : > { %1573 = vmatprep.mubr.msk.bf16.mxu0 %vm1960_vm1, %v1959_v2 }
  0xff   : > { %v2202_v11 = vpop.permute.xlu1 %881 }
 0x100   : > { %vm898_vm3 = vcmp.eq.s32.totalorder %v2202_v11, %v2200_v10 }
 0x103   : > { %v2206_v12 = vpop.permute.xlu1 %884 }
 0x104   : > { %vm899_vm4 = vcmp.eq.s32.totalorder %v2206_v12, %v2200_v10 }
 0x105   : > { %vm1537_vm5 = vmpackc.low %vm899_vm4, %vm898_vm3 }
 0x106   : > { %1585 = vmatprep.subr.msk.bf16.mxu1 %vm1537_vm5, %v1962_v13 }
 0x107   : > { %v2216_v14 = vpop.permute.xlu1 %893  ;;  %1586 = vmatpush3.bf16.msk.msra.mxu1 %vm1537_vm5, %v1962_v13 }
 0x108   : > { %vm902_vm9 = vcmp.eq.s32.totalorder %v2216_v14, %v2200_v10 }
 0x15d   : > { %v2218_v15 = vpop.permute.xlu1 %896 }
 0x15e   : > { %vm903_vm10 = vcmp.eq.s32.totalorder %v2218_v15, %v2200_v10 }
 0x15f   : > { %vm1541_vm11 = vmpackc.low %vm903_vm10, %vm902_vm9 }
 0x161   : > { %v2220_v16 = vpop.permute.xlu1 %887 }
 0x162   : > { %vm900_vm6 = vcmp.eq.s32.totalorder %v2220_v16, %v2200_v10 }
 0x165   : > { %v2224_v17 = vpop.permute.xlu1 %890 }
 0x166   : > { %vm901_vm7 = vcmp.eq.s32.totalorder %v2224_v17, %v2200_v10 }
 0x167   : > { %vm1539_vm8 = vmpackc.low %vm901_vm7, %vm900_vm6 }
 0x168   : > { %1587 = vmatprep.subr.msk.bf16.mxu1 %vm1539_vm8, %v1962_v13 }
 0x169   : > { %1588 = vmatpush3.bf16.msk.msra.mxu1 %vm1539_vm8, %v1962_v13 }
 0x16a   : > { %1589 = vmatprep.subr.msk.bf16.mxu1 %vm1541_vm11, %v1962_v13 }
 0x16d   : > { %1590 = vmatpush3.bf16.msk.msra.mxu1 %vm1541_vm11, %v1962_v13 }
 0x1c6   : > { %v715_v37 = vpop.f32.mrb[0].mxu0  ;;  %v786_v38 = vpop.f32.mrb[0].mxu1 }
 0x1c7   : > { %v813_v40 = vadd.f32 %v796_v35, %v715_v37  ;;  %v717_v41 = vpop.f32.mrb[1].mxu0  ;;  %v788_v42 = vpop.f32.mrb[1].mxu1  ;;  %v815_v51 = vadd.f32 %v804_v49, %v786_v38 }
 0x1c8   : > { %v814_v43 = vadd.f32 %v800_v36, %v717_v41  ;;  %v816_v48 = vadd.f32 %v808_v46, %v788_v42 }
 0x1c9   : > { %v1525_v44 = vmul.f32 -1.442695, %v813_v40 }
 0x1ca   : > { %v1526_v45 = vmul.f32 -1.442695, %v814_v43  ;;  %v1527_v50 = vmul.f32 -1.442695, %v816_v48 }
 0x1cb   : > { %1804 = vpow2.f32 %v1525_v44 }
 0x1cc   : > { %1806 = vpow2.f32 %v1526_v45 }
 0x1cd   : > { %1808 = vpow2.f32 %v1527_v50 }
 0x1ce   : > { %1810 = vtanh.f32 %v815_v51 }
 0x1d5   : > { %v1805_v52 = vpop.eup %1804 }
 0x1d6   : > { %v1807_v53 = vpop.eup %1806  ;;  %v820_v54 = vadd.f32 1.0, %v1805_v52 }
 0x1d7   : > { %v826_v55 = vadd.f32 1.0, %v1807_v53  ;;  %v1809_v56 = vpop.eup %1808  ;;  %v2271_v53 = vld [vmem:[#allocation6] sm:$0x1] }
 0x1d8   : > { %1812 = vrcp.f32 %v820_v54  ;;  %v1811_v57 = vpop.eup %1810  ;;  %v833_v62 = vadd.f32 1.0, %v1809_v56 }
 0x1d9   : > { %1814 = vrcp.f32 %v826_v55 }
 0x1da   : > { %1816 = vrcp.f32 %v833_v62 }
 0x1e2   : > { %v1813_v59 = vpop.eup %1812 }
 0x1e3   : > { %v1815_v60 = vpop.eup %1814  ;;  %v838_v61 = vmul.f32 %v1813_v59, %v1811_v57 }
 0x1e4   : > { %v837_v63 = vmul.f32 %v1815_v60, %v836_v58  ;;  %v1817_v1 = vpop.eup %1816 }
 0x1e6   : > { %v839_v0 = vadd.f32 %v838_v61, %v837_v63 }
 0x1e8   : > { %1818 = vtanh.f32 %v839_v0  ;;  %842 = vst [vmem:[#allocation3] sm:$0xf] %v839_v0 }
 0x1f2   : > { %v1819_v3 = vpop.eup %1818 }
 0x1f3   : > { %v841_v4 = vmul.f32 %v1819_v3, %v1817_v1 }
 0x1f5   : > { %843 = vst [vmem:[#allocation2] sm:$0xf] %v841_v4  ;;  %v844_v5 = vpack.c.bf16 %v841_v4, %v841_v4 }
 0x1f7   : > { %845 = vst [vmem:[#allocation4] sm:$0x3] %v844_v5 }
 0x1fe   : > { %v919_v6 = vld [vmem:[#allocation4] sm:$0x3] }
 0x1ff   : > { %1572 = vmatpush3.bf16.xpose.msra.mxu0 %v919_v6 }
 0x206   : > { %1574 = vmatmul.mubr.bf16.vlgmr.msra.gmra.mrb[4].mxu0 %v2181_v7 }
 0x207   : > { %1577 = vmatprep.mubr.msk.bf16.mxu0 %vm1960_vm1, %v1959_v2 }
 0x20e   : > { %1578 = vmatmul.mubr.bf16.gmra.mrb[8].mxu0 %v2189_v8 }
 0x20f   : > { %1581 = vmatprep.mubr.msk.bf16.mxu0 %vm1960_vm1, %v1959_v2 }
 0x216   : > { %1582 = vmatmul.mubr.bf16.gmra.mrb[12].mxu0 %v2197_v9 }
 0x2d9   : > { %v972_v19 = vpop.f32.mrb[4].mxu0 }
 0x2da   : > { %v1575_v20 = vpop.f32.mrb[5].mxu0  ;;  %v995_v31 = vsel %vm898_vm3, %v972_v19, -1e+30 }
 0x2db   : > { %v975_v21 = vpop.f32.mrb[6].mxu0  ;;  %v1002_v37 = vsel %vm849_vm2, %v995_v31, -inf }
 0x2dc   : > { %v1576_v22 = vpop.f32.mrb[7].mxu0  ;;  %v996_v34 = vsel %vm899_vm4, %v975_v21, -1e+30 }
 0x2dd   : > { %v1003_v43 = vsel %vm849_vm2, %v996_v34, -inf }
 0x2e1   : > { %v980_v23 = vpop.f32.mrb[8].mxu0 }
 0x2e2   : > { %v997_v24 = vsel %vm900_vm6, %v980_v23, -1e+30  ;;  %v1579_v25 = vpop.f32.mrb[9].mxu0 }
 0x2e3   : > { %v983_v26 = vpop.f32.mrb[10].mxu0  ;;  %v1004_v29 = vsel %vm849_vm2, %v997_v24, -inf }
 0x2e4   : > { %v998_v27 = vsel %vm901_vm7, %v983_v26, -1e+30  ;;  %v1580_v28 = vpop.f32.mrb[11].mxu0 }
 0x2e5   : > { %v1005_v2 = vsel %vm849_vm2, %v998_v27, -inf }
 0x2e6   : > { %v1011_v30 = vmax.f32 %v1004_v29, %v1005_v2 }
 0x2e9   : > { %v988_v33 = vpop.f32.mrb[12].mxu0 }
 0x2ea   : > { %v999_v35 = vsel %vm902_vm9, %v988_v33, -1e+30  ;;  %v1583_v36 = vpop.f32.mrb[13].mxu0 }
 0x2eb   : > { %v1006_v38 = vsel %vm849_vm2, %v999_v35, -inf  ;;  %v991_v39 = vpop.f32.mrb[14].mxu0 }
 0x2ec   : > { %v1007_v40 = vmax.f32 %v1002_v37, %v1006_v38  ;;  %v1000_v41 = vsel %vm903_vm10, %v991_v39, -1e+30  ;;  %v1584_v42 = vpop.f32.mrb[15].mxu0 }
 0x2ed   : > { %v1008_v44 = vsel %vm849_vm2, %v1000_v41, -inf }
 0x2ee   : > { %v1009_v45 = vmax.f32 %v1003_v43, %v1008_v44 }
 0x2f0   : > { %v1010_v46 = vmax.f32 %v1007_v40, %v1009_v45 }
 0x2f2   : > { %v1012_v47 = vmax.f32 %v1010_v46, %v1011_v30 }
 0x2f4   : > { %v1013_v48 = vrot.slane %v1012_v47, 4 }
 0x2f6   : > { %v1014_v49 = vmax.f32 %v1012_v47, %v1013_v48 }
 0x2f8   : > { %v1015_v50 = vrot.slane %v1014_v49, 2 }
 0x2fa   : > { %v1016_v51 = vmax.f32 %v1014_v49, %v1015_v50 }
 0x2fc   : > { %v1017_v52 = vrot.slane %v1016_v51, 1 }
 0x2fe   : > { %v1018_v54 = vmax.f32 %v1016_v51, %v1017_v52 }
 0x300   : > { %v2274_v55 = vmax.f32 %v2271_v53, %v1018_v54 }
 0x302   : > { %v1021_v56 = vsub.f32 %v2271_v53, %v2274_v55  ;;  %v1028_v57 = vrot.slane %v2274_v55, %v2172_v32  ;;  %1096 = vst.msk [vmem:[#allocation6] sm:$0x1] %vm846_vm12, %v2274_v55 }
 0x304   : > { %v1035_v58 = vsub.f32 %v991_v39, %v1028_v57  ;;  %v1032_v59 = vsub.f32 %v980_v23, %v1028_v57  ;;  %v1030_v60 = vsub.f32 %v972_v19, %v1028_v57  ;;  %v1031_v61 = vsub.f32 %v975_v21, %v1028_v57 }
 0x305   : > { %v1033_v62 = vsub.f32 %v983_v26, %v1028_v57  ;;  %v1034_v63 = vsub.f32 %v988_v33, %v1028_v57 }
 0x306   : > { %v1038_v0 = vsel %vm900_vm6, %v1032_v59, 0.0  ;;  %v1036_v1 = vsel %vm898_vm3, %v1030_v60, 0.0  ;;  %v1037_v5 = vsel %vm899_vm4, %v1031_v61, 0.0  ;;  %v1041_v21 = vsel %vm903_vm10, %v1035_v58, 0.0 }
 0x307   : > { %v1048_v3 = vsel %vm849_vm2, %v1038_v0, 0.0  ;;  %v1042_v4 = vsel %vm849_vm2, %v1036_v1, 0.0  ;;  %v1045_v6 = vsel %vm849_vm2, %v1037_v5, 0.0  ;;  %v1039_v13 = vsel %vm901_vm7, %v1033_v62, 0.0 }
 0x308   : > { %1049 = vadd.xlane.f32.xlu0 %v1048_v3  ;;  %1043 = vadd.xlane.f32.xlu1 %v1042_v4  ;;  %v1051_v18 = vsel %vm849_vm2, %v1039_v13, 0.0  ;;  %v1040_v19 = vsel %vm902_vm9, %v1034_v63, 0.0  ;;  %v1057_v22 = vsel %vm849_vm2, %v1041_v21, 0.0  ;;  %v1097_v63 = vld [vmem:[#allocation7] sm:$0x1] }
 0x309   : > { %v1054_v20 = vsel %vm849_vm2, %v1040_v19, 0.0 }
 0x30c   : > { %1046 = vadd.xlane.f32.xlu1 %v1045_v6 }
 0x310   : > { %1052 = vadd.xlane.f32.xlu1 %v1051_v18 }
 0x314   : > { %1055 = vadd.xlane.f32.xlu1 %v1054_v20 }
 0x318   : > { %1058 = vadd.xlane.f32.xlu1 %v1057_v22 }
 0x395   : > { %v1050_v23 = vpop.xlane.xlu0 %1049  ;;  %v1044_v24 = vpop.xlane.xlu1 %1043 }
 0x396   : > { %v1060_v25 = vmul.f32 1.442695, %v1044_v24  ;;  %v1064_v26 = vmul.f32 1.442695, %v1050_v23  ;;  %v1247_v23 = vld [vmem:[#allocation8 + $0x10] sm:$0xff]  ;;  %v1245_v24 = vld [vmem:[#allocation8] sm:$0xff] }
 0x398   : > { %1820 = vpow2.f32 %v1060_v25  ;;  %v1248_v25 = vld [vmem:[#allocation8 + $0x18] sm:$0xff] }
 0x399   : > { %v1047_v27 = vpop.xlane.xlu1 %1046  ;;  %1822 = vpow2.f32 %v1064_v26 }
 0x39a   : > { %v1062_v28 = vmul.f32 1.442695, %v1047_v27  ;;  %v1246_v27 = vld [vmem:[#allocation8 + $0x8] sm:$0xff] }
 0x39c   : > { %1824 = vpow2.f32 %v1062_v28 }
 0x39d   : > { %v1053_v29 = vpop.xlane.xlu1 %1052 }
 0x39e   : > { %v1066_v2 = vmul.f32 1.442695, %v1053_v29 }
 0x3a0   : > { %1826 = vpow2.f32 %v1066_v2 }
 0x3a1   : > { %v1056_v30 = vpop.xlane.xlu1 %1055 }
 0x3a2   : > { %v1068_v31 = vmul.f32 1.442695, %v1056_v30  ;;  %v1821_v33 = vpop.eup %1820 }
 0x3a3   : > { %v1823_v34 = vpop.eup %1822  ;;  %v1072_v35 = vsel %vm898_vm3, %v1821_v33, 0.0 }
 0x3a4   : > { %1828 = vpow2.f32 %v1068_v31  ;;  %v1078_v41 = vsel %vm849_vm2, %v1072_v35, 0.0  ;;  %v1074_v43 = vsel %vm900_vm6, %v1823_v34, 0.0 }
 0x3a5   : > { %v1059_v36 = vpop.xlane.xlu1 %1058  ;;  %v1081_v47 = vsel %vm849_vm2, %v1074_v43, 0.0 }
 0x3a6   : > { %v1825_v37 = vpop.eup %1824  ;;  %v1070_v38 = vmul.f32 1.442695, %v1059_v36 }
 0x3a7   : > { %v1073_v39 = vsel %vm899_vm4, %v1825_v37, 0.0  ;;  %v1101_v40 = vpack.c.bf16 %v1825_v37, %v1821_v33 }
 0x3a8   : > { %v1079_v42 = vsel %vm849_vm2, %v1073_v39, 0.0  ;;  %1830 = vpow2.f32 %v1070_v38  ;;  %v1251_v39 = vld [vmem:[#allocation8 + $0x30] sm:$0xff] }
 0x3a9   : > { %v1080_v44 = vadd.f32 %v1079_v42, %v1078_v41  ;;  %v1104_v11 = vmul.bf16 %v2181_v7, %v1101_v40  ;;  %v1022_v7 = vmul.f32 1.442695, %v1021_v56  ;;  %v1249_v40 = vld [vmem:[#allocation8 + $0x20] sm:$0xff]  ;;  %v1252_v42 = vld [vmem:[#allocation8 + $0x38] sm:$0xff] }
 0x3aa   : > { %v1827_v45 = vpop.eup %1826 }
 0x3ab   : > { %v1075_v46 = vsel %vm901_vm7, %v1827_v45, 0.0  ;;  %1107 = vxpose.xlu1.c.b16.start [1/3] (short) %v1104_v11, 128  ;;  %v1102_v12 = vpack.c.bf16 %v1827_v45, %v1823_v34  ;;  %v1082_v48 = vadd.f32 %v1081_v47, %v1080_v44  ;;  %1832 = vpow2.f32 %v1022_v7  ;;  %v1250_v44 = vld [vmem:[#allocation8 + $0x28] sm:$0xff] }
 0x3ac   : > { %v1083_v51 = vsel %vm849_vm2, %v1075_v46, 0.0 }
 0x3ad   : > { %v1105_v49 = vmul.bf16 %v2189_v8, %v1102_v12  ;;  %v1084_v52 = vadd.f32 %v1083_v51, %v1082_v48 }
 0x3ae   : > { %v1829_v50 = vpop.eup %1828 }
 0x3af   : > { %v1076_v16 = vsel %vm902_vm9, %v1829_v50, 0.0  ;;  %1108 = vxpose.xlu1.c.b16.cont [2/3] (short) %v1105_v49, 128 }
 0x3b0   : > { %v1085_v17 = vsel %vm849_vm2, %v1076_v16, 0.0 }
 0x3b1   : > { %v1086_v57 = vadd.f32 %v1085_v17, %v1084_v52 }
 0x3b2   : > { %v1831_v54 = vpop.eup %1830 }
 0x3b3   : > { %v1077_v8 = vsel %vm903_vm10, %v1831_v54, 0.0  ;;  %v1103_v58 = vpack.c.bf16 %v1831_v54, %v1829_v50 }
 0x3b4   : > { %v1087_v59 = vsel %vm849_vm2, %v1077_v8, 0.0 }
 0x3b5   : > { %v1088_v14 = vadd.f32 %v1087_v59, %v1086_v57  ;;  %v1106_v60 = vmul.bf16 %v2197_v9, %v1103_v58  ;;  %v1833_v62 = vpop.eup %1832  ;;  %v1255_v58 = vld [vmem:[#allocation8 + $0x50] sm:$0xff] }
 0x3b6   : > { %v1098_v3 = vmul.f32 %v1833_v62, %v1097_v63  ;;  %v2346_v22 = vrot.slane %v1833_v62, %v2172_v32 }
 0x3b7   : > { %v1089_v61 = vrot.slane %v1088_v14, 4  ;;  %1109 = vxpose.xlu1.c.b16.end [3/3] (short) %v1106_v60, 128  ;;  %v1253_v60 = vld [vmem:[#allocation8 + $0x40] sm:$0xff] }
 0x3b8   : > { %v1269_v26 = vmul.f32 %v2346_v22, %v1247_v23  ;;  %v1267_v29 = vmul.f32 %v2346_v22, %v1245_v24  ;;  %v1270_v31 = vmul.f32 %v2346_v22, %v1248_v25  ;;  %v1268_v35 = vmul.f32 %v2346_v22, %v1246_v27  ;;  %v1259_v23 = vld [vmem:[#allocation8 + $0x70] sm:$0xff] }
 0x3b9   : > { %v1090_v53 = vadd.f32 %v1089_v61, %v1088_v14  ;;  %v1273_v43 = vmul.f32 %v2346_v22, %v1251_v39  ;;  %v1271_v45 = vmul.f32 %v2346_v22, %v1249_v40  ;;  %v1274_v48 = vmul.f32 %v2346_v22, %v1252_v42 }
 0x3ba   : > { %v1272_v16 = vmul.f32 %v2346_v22, %v1250_v44  ;;  %v1275_v63 = vmul.f32 %v2346_v22, %v1253_v60 }
 0x3bb   : > { %v1091_v55 = vrot.slane %v1090_v53, 2 }
 0x3bd   : > { %v1092_v56 = vadd.f32 %v1091_v55, %v1090_v53  ;;  %v1256_v53 = vld [vmem:[#allocation8 + $0x58] sm:$0xff]  ;;  %v1277_v55 = vmul.f32 %v2346_v22, %v1255_v58 }
 0x3bf   : > { %v1093_v0 = vrot.slane %v1092_v56, 1 }
 0x3c1   : > { %v1094_v1 = vadd.f32 %v1093_v0, %v1092_v56  ;;  %v1254_v56 = vld [vmem:[#allocation8 + $0x48] sm:$0xff] }
 0x3c3   : > { %v1099_v4 = vadd.f32 %v1098_v3, %v1094_v1  ;;  %v1278_v3 = vmul.f32 %v2346_v22, %v1256_v53 }
 0x3c5   : > { %1100 = vst.msk [vmem:[#allocation7] sm:$0x1] %vm846_vm12, %v1099_v4 }
 0x3cc   : > { %v1318_v20 = vld [vmem:[#allocation7] sm:$0x1] }
 0x3cd   : > { %v1319_v21 = vadd.f32 1e-16, %v1318_v20 }
 0x3cf   : > { %1834 = vrcp.f32 %v1319_v21 }
 0x3d9   : > { %v1835_v41 = vpop.eup %1834 }
 0x3da   : > { %v2359_v46 = vrot.slane %v1835_v41, %v2172_v32 }
 0x415   : > { %v1115_v10 = vpop.trf.xlu1 }
 0x416   : > { %1591 = vmatprep.mubr.msk.bf16.mxu1 %vm1123_vm13, %v1115_v10 }
 0x419   : > { %v1116_v15 = vpop.trf.xlu1 }
 0x41a   : > { %1592 = vmatmul.mubr.msk.bf16.vlgmr.msra.gmra.mrb[4].mxu1 %vm1123_vm13, %v1116_v15 }
 0x41d   : > { %v1117_v9 = vpop.trf.xlu1 }
 0x41e   : > { %1595 = vmatprep.mubr.msk.bf16.mxu1 %vm1123_vm13, %v1117_v9  ;;  %v1276_v9 = vmul.f32 %v2346_v22, %v1254_v56 }
 0x421   : > { %v1118_v5 = vpop.trf.xlu1 }
 0x422   : > { %1596 = vmatmul.mubr.msk.bf16.gmra.mrb[8].mxu1 %vm1123_vm13, %v1118_v5 }
 0x425   : > { %v1119_v6 = vpop.trf.xlu1 }
 0x426   : > { %1599 = vmatprep.mubr.msk.bf16.mxu1 %vm1123_vm13, %v1119_v6 }
 0x429   : > { %v1120_v13 = vpop.trf.xlu1 }
 0x42a   : > { %1600 = vmatmul.mubr.msk.bf16.gmra.mrb[12].mxu1 %vm1123_vm13, %v1120_v13 }
 0x42d   : > { %v1121_v18 = vpop.trf.xlu1 }
 0x42e   : > { %1603 = vmatprep.mubr.msk.bf16.mxu1 %vm1123_vm13, %v1121_v18 }
 0x431   : > { %v1122_v19 = vpop.trf.xlu1 }
 0x432   : > { %1604 = vmatmul.mubr.msk.bf16.gmra.mrb[16].mxu1 %vm1123_vm13, %v1122_v19 }
 0x4ed   : > { %v1593_v28 = vpop.f32.mrb[4].mxu1 }
 0x4ee   : > { %v1285_v2 = vadd.f32 %v1593_v28, %v1269_v26  ;;  %v1182_v30 = vpop.f32.mrb[5].mxu1  ;;  %v1257_v26 = vld [vmem:[#allocation8 + $0x60] sm:$0xff]  ;;  %v1260_v28 = vld [vmem:[#allocation8 + $0x78] sm:$0xff] }
 0x4ef   : > { %v1283_v33 = vadd.f32 %v1267_v29, %v1182_v30  ;;  %v1594_v34 = vpop.f32.mrb[6].mxu1  ;;  %v1281_v29 = vmul.f32 %v2346_v22, %v1259_v23 }
 0x4f0   : > { %1301 = vst.msk [vmem:[#allocation8 + $0x10] sm:$0xff] %vm849_vm2, %v1285_v2  ;;  %v1286_v36 = vadd.f32 %v1594_v34, %v1270_v31  ;;  %v1185_v37 = vpop.f32.mrb[7].mxu1  ;;  %v1258_v2 = vld [vmem:[#allocation8 + $0x68] sm:$0xff]  ;;  %v1279_v31 = vmul.f32 %v2346_v22, %v1257_v26 }
 0x4f1   : > { %1299 = vst.msk [vmem:[#allocation8] sm:$0xff] %vm849_vm2, %v1283_v33  ;;  %v1284_v38 = vadd.f32 %v1268_v35, %v1185_v37  ;;  %v1282_v35 = vmul.f32 %v2346_v22, %v1260_v28  ;;  %v1280_v39 = vmul.f32 %v2346_v22, %v1258_v2 }
 0x4f2   : > { %1302 = vst.msk [vmem:[#allocation8 + $0x18] sm:$0xff] %vm849_vm2, %v1286_v36 }
 0x4f3   : > { %1300 = vst.msk [vmem:[#allocation8 + $0x8] sm:$0xff] %vm849_vm2, %v1284_v38 }
 0x4f5   : > { %v1597_v11 = vpop.f32.mrb[8].mxu1 }
 0x4f6   : > { %v1289_v12 = vadd.f32 %v1597_v11, %v1273_v43  ;;  %v1198_v47 = vpop.f32.mrb[9].mxu1 }
 0x4f7   : > { %v1324_v49 = vld [vmem:[#allocation8 + $0x10] sm:$0xff]  ;;  %v1287_v50 = vadd.f32 %v1271_v45, %v1198_v47  ;;  %v1598_v51 = vpop.f32.mrb[10].mxu1 }
 0x4f8   : > { %v1346_v7 = vmul.f32 %v2359_v46, %v1324_v49  ;;  %v1322_v17 = vld [vmem:[#allocation8] sm:$0xff]  ;;  %1305 = vst.msk [vmem:[#allocation8 + $0x30] sm:$0xff] %vm849_vm2, %v1289_v12  ;;  %v1290_v52 = vadd.f32 %v1598_v51, %v1274_v48  ;;  %v1201_v54 = vpop.f32.mrb[11].mxu1 }
 0x4f9   : > { %v1344_v57 = vmul.f32 %v2359_v46, %v1322_v17  ;;  %v1325_v32 = vld [vmem:[#allocation8 + $0x18] sm:$0xff]  ;;  %1303 = vst.msk [vmem:[#allocation8 + $0x20] sm:$0xff] %vm849_vm2, %v1287_v50  ;;  %v1288_v8 = vadd.f32 %v1272_v16, %v1201_v54  ;;  %v1380_v54 = vld [vmem:[#allocation2] sm:$0xf] (!%p1551_p6) }
 0x4fa   : > { %1362 = vst.msk [vmem:[#allocation5 + $0x10] sm:$0xff] %vm849_vm2, %v1346_v7  ;;  %v1347_v59 = vmul.f32 %v2359_v46, %v1325_v32  ;;  %v1323_v14 = vld [vmem:[#allocation8 + $0x8] sm:$0xff]  ;;  %1306 = vst.msk [vmem:[#allocation8 + $0x38] sm:$0xff] %vm849_vm2, %v1290_v52 }
 0x4fb   : > { %1360 = vst.msk [vmem:[#allocation5] sm:$0xff] %vm849_vm2, %v1344_v57  ;;  %v1345_v61 = vmul.f32 %v2359_v46, %v1323_v14  ;;  %1304 = vst.msk [vmem:[#allocation8 + $0x28] sm:$0xff] %vm849_vm2, %v1288_v8 }
 0x4fc   : > { %1363 = vst.msk [vmem:[#allocation5 + $0x18] sm:$0xff] %vm849_vm2, %v1347_v59  ;;  %1381 = vst [vmem:[#allocation14] sm:$0xf] (!%p1551_p6), %v1380_v54 }
 0x4fd   : > { %1361 = vst.msk [vmem:[#allocation5 + $0x8] sm:$0xff] %vm849_vm2, %v1345_v61  ;;  %v1601_v62 = vpop.f32.mrb[12].mxu1 }
 0x4fe   : > { %v1293_v0 = vadd.f32 %v1601_v62, %v1277_v55  ;;  %v1214_v1 = vpop.f32.mrb[13].mxu1 }
 0x4ff   : > { %v1328_v4 = vld [vmem:[#allocation8 + $0x30] sm:$0xff]  ;;  %v1291_v10 = vadd.f32 %v1275_v63, %v1214_v1  ;;  %v1602_v15 = vpop.f32.mrb[14].mxu1 }
 0x500   : > { %v1350_v5 = vmul.f32 %v2359_v46, %v1328_v4  ;;  %v1326_v6 = vld [vmem:[#allocation8 + $0x20] sm:$0xff]  ;;  %1309 = vst.msk [vmem:[#allocation8 + $0x50] sm:$0xff] %vm849_vm2, %v1293_v0  ;;  %v1294_v13 = vadd.f32 %v1602_v15, %v1278_v3  ;;  %v1217_v18 = vpop.f32.mrb[15].mxu1 }
 0x501   : > { %v1348_v19 = vmul.f32 %v2359_v46, %v1326_v6  ;;  %v1329_v20 = vld [vmem:[#allocation8 + $0x38] sm:$0xff]  ;;  %1307 = vst.msk [vmem:[#allocation8 + $0x40] sm:$0xff] %vm849_vm2, %v1291_v10  ;;  %v1292_v21 = vadd.f32 %v1276_v9, %v1217_v18 }
 0x502   : > { %1366 = vst.msk [vmem:[#allocation5 + $0x30] sm:$0xff] %vm849_vm2, %v1350_v5  ;;  %v1351_v24 = vmul.f32 %v2359_v46, %v1329_v20  ;;  %v1327_v25 = vld [vmem:[#allocation8 + $0x28] sm:$0xff]  ;;  %1310 = vst.msk [vmem:[#allocation8 + $0x58] sm:$0xff] %vm849_vm2, %v1294_v13  ;;  %v1382_v57 = vld [vmem:[#allocation5] sm:$0xff] (!%p1551_p6) }
 0x503   : > { %1364 = vst.msk [vmem:[#allocation5 + $0x20] sm:$0xff] %vm849_vm2, %v1348_v19  ;;  %v1349_v27 = vmul.f32 %v2359_v46, %v1327_v25  ;;  %1308 = vst.msk [vmem:[#allocation8 + $0x48] sm:$0xff] %vm849_vm2, %v1292_v21  ;;  %v1385_v8 = vld [vmem:[#allocation5 + $0x18] sm:$0xff] (!%p1551_p6) }
 0x504   : > { %1367 = vst.msk [vmem:[#allocation5 + $0x38] sm:$0xff] %vm849_vm2, %v1351_v24  ;;  %v1383_v32 = vld [vmem:[#allocation5 + $0x8] sm:$0xff] (!%p1551_p6)  ;;  %1398 = vst.msk [vmem:[%s2523_s6] sm:$0xff] (!%p1551_p6), %vm849_vm2, %v1382_v57 }
 0x505   : > { %1365 = vst.msk [vmem:[#allocation5 + $0x28] sm:$0xff] %vm849_vm2, %v1349_v27  ;;  %v1605_v30 = vpop.f32.mrb[16].mxu1  ;;  %1399 = vst.msk [vmem:[%s2523_s6 + $0x8] sm:$0xff] (!%p1551_p6), %vm849_vm2, %v1383_v32 }
 0x506   : > { %v1297_v33 = vadd.f32 %v1605_v30, %v1281_v29  ;;  %v1230_v34 = vpop.f32.mrb[17].mxu1  ;;  %1401 = vst.msk [vmem:[%s2523_s6 + $0x18] sm:$0xff] (!%p1551_p6), %vm849_vm2, %v1385_v8 }
 0x507   : > { %v1332_v36 = vld [vmem:[#allocation8 + $0x50] sm:$0xff]  ;;  %v1295_v37 = vadd.f32 %v1279_v31, %v1230_v34  ;;  %v1606_v38 = vpop.f32.mrb[18].mxu1 }
 0x508   : > { %v1354_v40 = vmul.f32 %v2359_v46, %v1332_v36  ;;  %v1330_v41 = vld [vmem:[#allocation8 + $0x40] sm:$0xff]  ;;  %1313 = vst.msk [vmem:[#allocation8 + $0x70] sm:$0xff] %vm849_vm2, %v1297_v33  ;;  %v1298_v42 = vadd.f32 %v1606_v38, %v1282_v35  ;;  %v1233_v43 = vpop.f32.mrb[19].mxu1 }
 0x509   : > { %v1352_v44 = vmul.f32 %v2359_v46, %v1330_v41  ;;  %v1333_v11 = vld [vmem:[#allocation8 + $0x58] sm:$0xff]  ;;  %1311 = vst.msk [vmem:[#allocation8 + $0x60] sm:$0xff] %vm849_vm2, %v1295_v37  ;;  %v1296_v45 = vadd.f32 %v1280_v39, %v1233_v43  ;;  %v1388_v14 = vld [vmem:[#allocation5 + $0x30] sm:$0xff] (!%p1551_p6) }
 0x50a   : > { %1370 = vst.msk [vmem:[#allocation5 + $0x50] sm:$0xff] %vm849_vm2, %v1354_v40  ;;  %v1355_v12 = vmul.f32 %v2359_v46, %v1333_v11  ;;  %v1331_v47 = vld [vmem:[#allocation8 + $0x48] sm:$0xff]  ;;  %1314 = vst.msk [vmem:[#allocation8 + $0x78] sm:$0xff] %vm849_vm2, %v1298_v42  ;;  %v1386_v58 = vld [vmem:[#allocation5 + $0x20] sm:$0xff] (!%p1551_p6) }
 0x50b   : > { %1368 = vst.msk [vmem:[#allocation5 + $0x40] sm:$0xff] %vm849_vm2, %v1352_v44  ;;  %v1353_v22 = vmul.f32 %v2359_v46, %v1331_v47  ;;  %1312 = vst.msk [vmem:[#allocation8 + $0x68] sm:$0xff] %vm849_vm2, %v1296_v45  ;;  %v1389_v60 = vld [vmem:[#allocation5 + $0x38] sm:$0xff] (!%p1551_p6) }
 0x50c   : > { %1371 = vst.msk [vmem:[#allocation5 + $0x58] sm:$0xff] %vm849_vm2, %v1355_v12  ;;  %1402 = vst.msk [vmem:[%s2523_s6 + $0x20] sm:$0xff] (!%p1551_p6), %vm849_vm2, %v1386_v58  ;;  %v1387_v59 = vld [vmem:[#allocation5 + $0x28] sm:$0xff] (!%p1551_p6) }
 0x50d   : > { %1369 = vst.msk [vmem:[#allocation5 + $0x48] sm:$0xff] %vm849_vm2, %v1353_v22  ;;  %1403 = vst.msk [vmem:[%s2523_s6 + $0x28] sm:$0xff] (!%p1551_p6), %vm849_vm2, %v1387_v59 }
 0x50e   : > { %1404 = vst.msk [vmem:[%s2523_s6 + $0x30] sm:$0xff] (!%p1551_p6), %vm849_vm2, %v1388_v14  ;;  %1405 = vst.msk [vmem:[%s2523_s6 + $0x38] sm:$0xff] (!%p1551_p6), %vm849_vm2, %v1389_v60 }
 0x50f   : > { %v1336_v48 = vld [vmem:[#allocation8 + $0x70] sm:$0xff]  ;;  %1379 = sbr.rel (%p1551_p6) target bundleno = 1310 (0x51e), region = 64 }
 0x510   : > { %v1358_v49 = vmul.f32 %v2359_v46, %v1336_v48  ;;  %v1334_v50 = vld [vmem:[#allocation8 + $0x60] sm:$0xff] }
 0x511   : > { %v1356_v51 = vmul.f32 %v2359_v46, %v1334_v50  ;;  %v1337_v16 = vld [vmem:[#allocation8 + $0x78] sm:$0xff]  ;;  %v1392_v55 = vld [vmem:[#allocation5 + $0x50] sm:$0xff] (!%p1551_p6) }
 0x512   : > { %1374 = vst.msk [vmem:[#allocation5 + $0x70] sm:$0xff] %vm849_vm2, %v1358_v49  ;;  %v1359_v7 = vmul.f32 %v2359_v46, %v1337_v16  ;;  %v1335_v17 = vld [vmem:[#allocation8 + $0x68] sm:$0xff]  ;;  %v1390_v61 = vld [vmem:[#allocation5 + $0x40] sm:$0xff] (!%p1551_p6)  ;;  %1408 = vst.msk [vmem:[%s2523_s6 + $0x50] sm:$0xff] (!%p1551_p6), %vm849_vm2, %v1392_v55 }
 0x513   : > { %1372 = vst.msk [vmem:[#allocation5 + $0x60] sm:$0xff] %vm849_vm2, %v1356_v51  ;;  %v1357_v52 = vmul.f32 %v2359_v46, %v1335_v17  ;;  %v1384_v46 = vld [vmem:[#allocation5 + $0x10] sm:$0xff] (!%p1551_p6)  ;;  %1406 = vst.msk [vmem:[%s2523_s6 + $0x40] sm:$0xff] (!%p1551_p6), %vm849_vm2, %v1390_v61  ;;  %v1393_v56 = vld [vmem:[#allocation5 + $0x58] sm:$0xff] (!%p1551_p6) }
 0x514   : > { %1375 = vst.msk [vmem:[#allocation5 + $0x78] sm:$0xff] %vm849_vm2, %v1359_v7  ;;  %1400 = vst.msk [vmem:[%s2523_s6 + $0x10] sm:$0xff] (!%p1551_p6), %vm849_vm2, %v1384_v46  ;;  %v1391_v53 = vld [vmem:[#allocation5 + $0x48] sm:$0xff] (!%p1551_p6) }
 0x515   : > { %1373 = vst.msk [vmem:[#allocation5 + $0x68] sm:$0xff] %vm849_vm2, %v1357_v52  ;;  %1407 = vst.msk [vmem:[%s2523_s6 + $0x48] sm:$0xff] (!%p1551_p6), %vm849_vm2, %v1391_v53 }
 0x516   : > { %1409 = vst.msk [vmem:[%s2523_s6 + $0x58] sm:$0xff] %vm849_vm2, %v1393_v56 }
 0x519   : > { %v1396_v0 = vld [vmem:[#allocation5 + $0x70] sm:$0xff] }
 0x51a   : > { %v1394_v62 = vld [vmem:[#allocation5 + $0x60] sm:$0xff]  ;;  %1412 = vst.msk [vmem:[%s2523_s6 + $0x70] sm:$0xff] %vm849_vm2, %v1396_v0 }
 0x51b   : > { %1410 = vst.msk [vmem:[%s2523_s6 + $0x60] sm:$0xff] %vm849_vm2, %v1394_v62  ;;  %v1397_v1 = vld [vmem:[#allocation5 + $0x78] sm:$0xff] }
 0x51c   : > { %v1395_v63 = vld [vmem:[#allocation5 + $0x68] sm:$0xff]  ;;  %1413 = vst.msk [vmem:[%s2523_s6 + $0x78] sm:$0xff] %vm849_vm2, %v1397_v1 }
 0x51d   : > { %1411 = vst.msk [vmem:[%s2523_s6 + $0x68] sm:$0xff] %vm849_vm2, %v1395_v63 }
 0x51e PF: > { %p2482_p4 = scmp.eq.s32.totalorder %s1515_s24, 2  ;;  %s1964_s11 = smov [#allocation14]  }
 0x51f   : > { %s1421_s12 = sshll.u32 %s1964_s11, 4  ;;  %s1422_s12 = int_to_ptr.vmem [resolvable:$true] %s1421_s12 }
 0x520   : > { %s1892_s13 = scalar_lea.vmem %s1422_s12, 64  ;;  %p1899_p12 = scmp.lt.s32.totalorder %s1422_s12, %s1422_s12 }
 0x521   : > { %p1893_p9 = scmp.ne.s32.totalorder %s1422_s12, %s1892_s13  ;;  %p1900_p13 = scmp.lt.s32.totalorder %s1892_s13, %s1892_s13 }
 0x523   : > { %p1894_p10 = pnand %p1893_p9, %p2482_p4  ;;  %p1901_p0 = por %p1900_p13, %p1899_p12 }
 0x525   : > { %p1895_p11 = pneg %p1894_p10 }
 0x527   : > { %p1902_p1 = pnand %p1901_p0, %p1895_p11 }
 0x529   : > { %1905 = shalt.err (!%p1902_p1)
}
 0x52a   : > { %s1906_s24 = scalar_lea.hbm %s2522_s5, 64 }
 0x52b   : > { %p1907_p2 = scmp.ne.s32.totalorder %s2522_s5, %s1906_s24  ;;  %p1912_p3 = scmp.lt.u32.totalorder %s1906_s24, %s2522_s5 }
 0x52d   : > { %p1908_p5 = pnand %p1907_p2, %p2482_p4 }
 0x52f   : > { %p1909_p7 = pneg %p1908_p5 }
 0x531   : > { %p1914_p8 = pnand %p1912_p3, %p1909_p7 }
 0x533   : > { %1917 = shalt.err (!%p1914_p8)
}
 0x534   : > { %1748 = dma.vmem_to_hbm [thread:$0]  (%p2482_p4), %s1422_s12, 64, %s2522_s5, [#allocation11]  }
 0x535   : > { %1939 = dma.done.wait (%p2482_p4), [#allocation11], 64  }
 0x536   : > { %1941 = vsyncadd (%p2482_p4), [#allocation11], 4294967232 }
 0x537 PF: > { %s20_s23 = sadd.s32 1, %s1952_s23   ;;  %s2533_s21 = smov %s1948_s22 }
 0x538   : > { %p17_p6 = scmp.ge.s32.totalorder %s20_s23, 5   ;;  %s2534_s22 = smov %s2536_s25 }
 0x53a   :  { %19 = sbr.rel (!%p17_p6) target bundleno = 4 (0x4), region = 103 }
 0x541   :  { %1440 = vsyncpa [#allocation10], 1 }
 0x542   :  { %1442 = vsyncpa [#allocation10 + $0x1], 1 }
 0x543   :  { %1443 = vsyncpa [#allocation13], 1 }
 0x544   :  { %1444 = vsyncpa [#allocation11], 1 }
 0x545   :  { %1446 = vsyncpa [#allocation11 + $0x1], 1 }

</bundles_post_ra>
